<compile_context>
chip_gen: v7x
topology: tpu7x:2x2x1
jax: 0.10.0
libtpu: 0.0.40
codegen_flags: <defaults>
</compile_context>

<pallas_src>
import functools

import jax
import jax.numpy as jnp
from jax.experimental import pallas as pl
from jax.experimental.pallas import tpu as pltpu

# ---- configuration (the PyTorch module asserts n_mid > 3, so n_mid=4; small dims) ----
D_AUG = 16
D_CODE = 8
D_MID = 64
D_OUT = 16
N_MID = 4
WITH_GRAD = False  # module default; forward returns xx=None


def _dims():
    dims = [D_AUG + D_CODE] + [D_MID] * N_MID + [D_OUT]
    if WITH_GRAD:
        dims += [3]
    return dims


def init_params(key):
    """PyTorch Conv1d-like init (uniform +-1/sqrt(fan_in)).
    Weights stored (out, in) = Conv1d kernel-size-1 layout; biases (out,)."""
    dims = _dims()
    skip_in = [N_MID // 2 + 1]
    num_layers = len(dims)

    def lin(k, fan_in, fan_out):
        kw, kb = jax.random.split(k)
        bound = 1.0 / jnp.sqrt(jnp.float32(fan_in))
        w = jax.random.uniform(kw, (fan_out, fan_in), jnp.float32, -bound, bound)
        b = jax.random.uniform(kb, (fan_out,), jnp.float32, -bound, bound)
        return w, b

    keys = jax.random.split(key, 2 + num_layers)
    params = {}
    params["mlp1_w0"], params["mlp1_b0"] = lin(keys[0], 3, 64)
    params["mlp1_w1"], params["mlp1_b1"] = lin(keys[1], 64, D_AUG)
    for l in range(num_layers - 1):
        if (l + 1) in skip_in:
            out_dim = dims[l + 1] - D_AUG - D_CODE
        else:
            out_dim = dims[l + 1]
        params[f"lin{l}_w"], params[f"lin{l}_b"] = lin(keys[2 + l], dims[l], out_dim)
    return params, num_layers, skip_in


def _build_weight_plan(params, num_layers, skip_in):
    """Flattened weight/bias list + static per-layer plan.

    parts code: 0 -> running activation x, 1 -> pos_f (mlp_1 output), 2 -> code.
    Concats are replaced by splitting the weight into column blocks, so e.g.
    W @ cat([x, pos_f, code]) becomes W_x@x + W_p@pos_f + W_c@code.
    """
    weights = [params["mlp1_w0"], params["mlp1_b0"].reshape(-1, 1),
               params["mlp1_w1"], params["mlp1_b1"].reshape(-1, 1)]
    layer_parts, relu_flags = [], []
    for l in range(num_layers - 1):
        w = params[f"lin{l}_w"]
        b = params[f"lin{l}_b"].reshape(-1, 1)
        if l == 0:
            # input is cat([pos_f, code])
            weights += [w[:, :D_AUG], w[:, D_AUG:D_AUG + D_CODE], b]
            layer_parts.append((1, 2))
        elif l in skip_in:
            # input is cat([x, pos_f, code])
            d_x = w.shape[1] - D_AUG - D_CODE
            weights += [w[:, :d_x], w[:, d_x:d_x + D_AUG], w[:, d_x + D_AUG:], b]
            layer_parts.append((0, 1, 2))
        else:
            weights += [w, b]
            layer_parts.append((0,))
        relu_flags.append(l < num_layers - 2)
    return weights, tuple(layer_parts), tuple(relu_flags)


def fusion_kernel(layer_parts, relu_flags, pos_ref, code_ref, *refs):
    """refs = (mlp1_w0, mlp1_b0, mlp1_w1, mlp1_b1, <split lin weights/biases>..., out_ref).
    All tiles are channel-major: (C, TM) with TM points on the lane axis."""
    out_ref = refs[-1]
    wrefs = refs[:-1]

    def dot(w, a):
        return jnp.dot(w, a, preferred_element_type=jnp.float32)

    pos = pos_ref[...]      # (3, TM)
    code = code_ref[...]    # (D_CODE, TM)

    # mlp_1: Conv1d(3,64,1) -> ReLU -> Conv1d(64, D_AUG, 1)
    h = jnp.maximum(dot(wrefs[0][...], pos) + wrefs[1][...], 0.0)   # (64, TM)
    pos_f = dot(wrefs[2][...], h) + wrefs[3][...]                   # (D_AUG, TM)

    feats = {1: pos_f, 2: code}
    x = None
    idx = 4
    for parts, relu in zip(layer_parts, relu_flags):
        acc = None
        for p in parts:                       # split matmuls replace concatenation
            a = x if p == 0 else feats[p]
            t = dot(wrefs[idx][...], a)
            acc = t if acc is None else acc + t
            idx += 1
        acc = acc + wrefs[idx][...]           # bias (Cout, 1) broadcast over lanes
        idx += 1
        x = jnp.maximum(acc, 0.0) if relu else acc
    out_ref[...] = x                          # (D_OUT, TM), lane-dense store
    # TODO(synk): with_grad=True would also emit the pre-ReLU features (xx);
    #             default with_grad=False returns xx=None (handled in wrapper).


def fusion_net_forward(pos, code, params, num_layers, skip_in, tm=512):
    """pos: (B, 3, N), code: (B, D_CODE, N) -> (x: (B, D_OUT, N), xx: None)."""
    B, _, N = pos.shape

    # Lane tile: multiple of 128; pad N so no masked tail and no divisibility assert.
    tm = min(tm, max(128, pl.cdiv(N, 128) * 128))
    n_pad = pl.cdiv(N, tm) * tm
    if n_pad != N:
        padding = ((0, 0), (0, 0), (0, n_pad - N))
        pos = jnp.pad(pos, padding)
        code = jnp.pad(code, padding)

    weights, layer_parts, relu_flags = _build_weight_plan(params, num_layers, skip_in)
    kernel = functools.partial(fusion_kernel, layer_parts, relu_flags)

    grid = (B, n_pad // tm)  # >= 2 steps keeps both v7x TensorCores busy

    def point_spec(c):
        return pl.BlockSpec((None, c, tm), lambda b, i: (b, 0, i))

    out = pl.pallas_call(
        kernel,
        out_shape=jax.ShapeDtypeStruct((B, D_OUT, n_pad), jnp.float32),
        grid_spec=pltpu.PrefetchScalarGridSpec(
            num_scalar_prefetch=0,
            grid=grid,
            in_specs=[point_spec(3), point_spec(D_CODE)]
                     + [pl.BlockSpec(w.shape, lambda b, i: (0, 0)) for w in weights],
            out_specs=pl.BlockSpec((None, D_OUT, tm), lambda b, i: (b, 0, i)),
        ),
        compiler_params=pltpu.CompilerParams(
            dimension_semantics=("parallel", "parallel")),
    )(pos, code, *weights)

    if n_pad != N:
        out = out[:, :, :N]
    return out, None  # with_grad=False -> xx is None


def fusion_net_reference(pos, code, params, num_layers, skip_in):
    """Pure-JAX reference of the PyTorch forward, for verification."""
    def conv1d(x, w, b):  # x: (B, Cin, N), w: (Cout, Cin), b: (Cout,)
        return jnp.einsum("oc,bcn->bon", w, x) + b[None, :, None]

    h = jax.nn.relu(conv1d(pos, params["mlp1_w0"], params["mlp1_b0"]))
    pos_f = conv1d(h, params["mlp1_w1"], params["mlp1_b1"])
    x = jnp.concatenate([pos_f, code], axis=1)
    for l in range(num_layers - 1):
        if l in skip_in:
            x = jnp.concatenate([x, pos_f, code], axis=1)
        x = conv1d(x, params[f"lin{l}_w"], params[f"lin{l}_b"])
        if l < num_layers - 2:
            x = jax.nn.relu(x)
    return x


if __name__ == "__main__":
    key = jax.random.PRNGKey(0)
    kp, kpos, kcode = jax.random.split(key, 3)
    params, num_layers, skip_in = init_params(kp)

    B, N = 2, 512  # grid = (2, 2) at tm=256: lane-dense tiles, megacore-friendly
    pos = jax.random.normal(kpos, (B, 3, N), jnp.float32)
    code = jax.random.normal(kcode, (B, D_CODE, N), jnp.float32)

    x, xx = fusion_net_forward(pos, code, params, num_layers, skip_in, tm=256)
    x = jax.block_until_ready(x)

    ref = fusion_net_reference(pos, code, params, num_layers, skip_in)
    assert x.shape == (B, D_OUT, N), x.shape
    assert xx is None
    max_err = float(jnp.max(jnp.abs(x - ref)))
    assert jnp.allclose(x, ref, atol=1e-4, rtol=1e-4), max_err
    print("KERNEL_OK")
</pallas_src>

<mosaic_0001>
module attributes {stable_mosaic.version = 11 : i64} {
  func.func @fusion_kernel(%arg0: i32, %arg1: i32, %arg2: memref<1x3x256xf32, #tpu.memory_space<vmem>>, %arg3: memref<1x8x256xf32, #tpu.memory_space<vmem>>, %arg4: memref<64x3xf32, #tpu.memory_space<vmem>>, %arg5: memref<64x1xf32, #tpu.memory_space<vmem>>, %arg6: memref<16x64xf32, #tpu.memory_space<vmem>>, %arg7: memref<16x1xf32, #tpu.memory_space<vmem>>, %arg8: memref<64x16xf32, #tpu.memory_space<vmem>>, %arg9: memref<64x8xf32, #tpu.memory_space<vmem>>, %arg10: memref<64x1xf32, #tpu.memory_space<vmem>>, %arg11: memref<64x64xf32, #tpu.memory_space<vmem>>, %arg12: memref<64x1xf32, #tpu.memory_space<vmem>>, %arg13: memref<40x64xf32, #tpu.memory_space<vmem>>, %arg14: memref<40x1xf32, #tpu.memory_space<vmem>>, %arg15: memref<64x40xf32, #tpu.memory_space<vmem>>, %arg16: memref<64x16xf32, #tpu.memory_space<vmem>>, %arg17: memref<64x8xf32, #tpu.memory_space<vmem>>, %arg18: memref<64x1xf32, #tpu.memory_space<vmem>>, %arg19: memref<16x64xf32, #tpu.memory_space<vmem>>, %arg20: memref<16x1xf32, #tpu.memory_space<vmem>>, %arg21: memref<1x16x256xf32, #tpu.memory_space<vmem>>) attributes {dimension_semantics = [#tpu.dimension_semantics<parallel>, #tpu.dimension_semantics<parallel>], iteration_bounds = array<i64: 2, 2>, scalar_prefetch = 0 : i64, scratch_operands = 0 : i64, tpu.core_type = #tpu.core_type<tc>, window_params = [{transform_indices = @transform_0, window_bounds = array<i64: 1, 3, 256>}, {transform_indices = @transform_1, window_bounds = array<i64: 1, 8, 256>}, {pipeline_mode = #tpu.pipeline_mode<synchronous>, transform_indices = @transform_2, window_bounds = array<i64: 64, 3>}, {pipeline_mode = #tpu.pipeline_mode<synchronous>, transform_indices = @transform_3, window_bounds = array<i64: 64, 1>}, {pipeline_mode = #tpu.pipeline_mode<synchronous>, transform_indices = @transform_4, window_bounds = array<i64: 16, 64>}, {pipeline_mode = #tpu.pipeline_mode<synchronous>, transform_indices = @transform_5, window_bounds = array<i64: 16, 1>}, {pipeline_mode = #tpu.pipeline_mode<synchronous>, transform_indices = @transform_6, window_bounds = array<i64: 64, 16>}, {pipeline_mode = #tpu.pipeline_mode<synchronous>, transform_indices = @transform_7, window_bounds = array<i64: 64, 8>}, {pipeline_mode = #tpu.pipeline_mode<synchronous>, transform_indices = @transform_8, window_bounds = array<i64: 64, 1>}, {pipeline_mode = #tpu.pipeline_mode<synchronous>, transform_indices = @transform_9, window_bounds = array<i64: 64, 64>}, {pipeline_mode = #tpu.pipeline_mode<synchronous>, transform_indices = @transform_10, window_bounds = array<i64: 64, 1>}, {pipeline_mode = #tpu.pipeline_mode<synchronous>, transform_indices = @transform_11, window_bounds = array<i64: 40, 64>}, {pipeline_mode = #tpu.pipeline_mode<synchronous>, transform_indices = @transform_12, window_bounds = array<i64: 40, 1>}, {pipeline_mode = #tpu.pipeline_mode<synchronous>, transform_indices = @transform_13, window_bounds = array<i64: 64, 40>}, {pipeline_mode = #tpu.pipeline_mode<synchronous>, transform_indices = @transform_14, window_bounds = array<i64: 64, 16>}, {pipeline_mode = #tpu.pipeline_mode<synchronous>, transform_indices = @transform_15, window_bounds = array<i64: 64, 8>}, {pipeline_mode = #tpu.pipeline_mode<synchronous>, transform_indices = @transform_16, window_bounds = array<i64: 64, 1>}, {pipeline_mode = #tpu.pipeline_mode<synchronous>, transform_indices = @transform_17, window_bounds = array<i64: 16, 64>}, {pipeline_mode = #tpu.pipeline_mode<synchronous>, transform_indices = @transform_18, window_bounds = array<i64: 16, 1>}, {transform_indices = @transform_19, window_bounds = array<i64: 1, 16, 256>}]} {
    %c0 = arith.constant 0 : index
    %c0_0 = arith.constant 0 : index
    %c0_1 = arith.constant 0 : index
    %0 = vector.load %arg2[%c0, %c0_0, %c0_1] : memref<1x3x256xf32, #tpu.memory_space<vmem>>, vector<1x3x256xf32>
    %1 = vector.shape_cast %0 : vector<1x3x256xf32> to vector<3x256xf32>
    %c0_2 = arith.constant 0 : index
    %c0_3 = arith.constant 0 : index
    %c0_4 = arith.constant 0 : index
    %2 = vector.load %arg3[%c0_2, %c0_3, %c0_4] : memref<1x8x256xf32, #tpu.memory_space<vmem>>, vector<1x8x256xf32>
    %3 = vector.shape_cast %2 : vector<1x8x256xf32> to vector<8x256xf32>
    %c0_5 = arith.constant 0 : index
    %c0_6 = arith.constant 0 : index
    %4 = vector.load %arg4[%c0_5, %c0_6] : memref<64x3xf32, #tpu.memory_space<vmem>>, vector<64x3xf32>
    %cst = arith.constant dense<0.000000e+00> : vector<64x256xf32>
    %5 = tpu.matmul %4, %1, %cst {dimension_numbers = #tpu.dot_dimension_numbers<[1], [0], [0], [1], [0, 0, 1, 1], [], []>} : vector<64x3xf32>, vector<3x256xf32>, vector<64x256xf32> -> vector<64x256xf32>
    %c0_7 = arith.constant 0 : index
    %c0_8 = arith.constant 0 : index
    %6 = vector.load %arg5[%c0_7, %c0_8] : memref<64x1xf32, #tpu.memory_space<vmem>>, vector<64x1xf32>
    %7 = vector.broadcast %6 : vector<64x1xf32> to vector<64x256xf32>
    %8 = arith.addf %5, %7 : vector<64x256xf32>
    %cst_9 = arith.constant 0.000000e+00 : f32
    %9 = vector.broadcast %cst_9 : f32 to vector<64x256xf32>
    %10 = arith.maximumf %8, %9 : vector<64x256xf32>
    %c0_10 = arith.constant 0 : index
    %c0_11 = arith.constant 0 : index
    %11 = vector.load %arg6[%c0_10, %c0_11] : memref<16x64xf32, #tpu.memory_space<vmem>>, vector<16x64xf32>
    %cst_12 = arith.constant dense<0.000000e+00> : vector<16x256xf32>
    %12 = tpu.matmul %11, %10, %cst_12 {dimension_numbers = #tpu.dot_dimension_numbers<[1], [0], [0], [1], [0, 0, 1, 1], [], []>} : vector<16x64xf32>, vector<64x256xf32>, vector<16x256xf32> -> vector<16x256xf32>
    %c0_13 = arith.constant 0 : index
    %c0_14 = arith.constant 0 : index
    %13 = vector.load %arg7[%c0_13, %c0_14] : memref<16x1xf32, #tpu.memory_space<vmem>>, vector<16x1xf32>
    %14 = vector.broadcast %13 : vector<16x1xf32> to vector<16x256xf32>
    %15 = arith.addf %12, %14 : vector<16x256xf32>
    %c0_15 = arith.constant 0 : index
    %c0_16 = arith.constant 0 : index
    %16 = vector.load %arg8[%c0_15, %c0_16] : memref<64x16xf32, #tpu.memory_space<vmem>>, vector<64x16xf32>
    %cst_17 = arith.constant dense<0.000000e+00> : vector<64x256xf32>
    %17 = tpu.matmul %16, %15, %cst_17 {dimension_numbers = #tpu.dot_dimension_numbers<[1], [0], [0], [1], [0, 0, 1, 1], [], []>} : vector<64x16xf32>, vector<16x256xf32>, vector<64x256xf32> -> vector<64x256xf32>
    %c0_18 = arith.constant 0 : index
    %c0_19 = arith.constant 0 : index
    %18 = vector.load %arg9[%c0_18, %c0_19] : memref<64x8xf32, #tpu.memory_space<vmem>>, vector<64x8xf32>
    %cst_20 = arith.constant dense<0.000000e+00> : vector<64x256xf32>
    %19 = tpu.matmul %18, %3, %cst_20 {dimension_numbers = #tpu.dot_dimension_numbers<[1], [0], [0], [1], [0, 0, 1, 1], [], []>} : vector<64x8xf32>, vector<8x256xf32>, vector<64x256xf32> -> vector<64x256xf32>
    %20 = arith.addf %17, %19 : vector<64x256xf32>
    %c0_21 = arith.constant 0 : index
    %c0_22 = arith.constant 0 : index
    %21 = vector.load %arg10[%c0_21, %c0_22] : memref<64x1xf32, #tpu.memory_space<vmem>>, vector<64x1xf32>
    %22 = vector.broadcast %21 : vector<64x1xf32> to vector<64x256xf32>
    %23 = arith.addf %20, %22 : vector<64x256xf32>
    %cst_23 = arith.constant 0.000000e+00 : f32
    %24 = vector.broadcast %cst_23 : f32 to vector<64x256xf32>
    %25 = arith.maximumf %23, %24 : vector<64x256xf32>
    %c0_24 = arith.constant 0 : index
    %c0_25 = arith.constant 0 : index
    %26 = vector.load %arg11[%c0_24, %c0_25] : memref<64x64xf32, #tpu.memory_space<vmem>>, vector<64x64xf32>
    %cst_26 = arith.constant dense<0.000000e+00> : vector<64x256xf32>
    %27 = tpu.matmul %26, %25, %cst_26 {dimension_numbers = #tpu.dot_dimension_numbers<[1], [0], [0], [1], [0, 0, 1, 1], [], []>} : vector<64x64xf32>, vector<64x256xf32>, vector<64x256xf32> -> vector<64x256xf32>
    %c0_27 = arith.constant 0 : index
    %c0_28 = arith.constant 0 : index
    %28 = vector.load %arg12[%c0_27, %c0_28] : memref<64x1xf32, #tpu.memory_space<vmem>>, vector<64x1xf32>
    %29 = vector.broadcast %28 : vector<64x1xf32> to vector<64x256xf32>
    %30 = arith.addf %27, %29 : vector<64x256xf32>
    %cst_29 = arith.constant 0.000000e+00 : f32
    %31 = vector.broadcast %cst_29 : f32 to vector<64x256xf32>
    %32 = arith.maximumf %30, %31 : vector<64x256xf32>
    %c0_30 = arith.constant 0 : index
    %c0_31 = arith.constant 0 : index
    %33 = vector.load %arg13[%c0_30, %c0_31] : memref<40x64xf32, #tpu.memory_space<vmem>>, vector<40x64xf32>
    %cst_32 = arith.constant dense<0.000000e+00> : vector<40x256xf32>
    %34 = tpu.matmul %33, %32, %cst_32 {dimension_numbers = #tpu.dot_dimension_numbers<[1], [0], [0], [1], [0, 0, 1, 1], [], []>} : vector<40x64xf32>, vector<64x256xf32>, vector<40x256xf32> -> vector<40x256xf32>
    %c0_33 = arith.constant 0 : index
    %c0_34 = arith.constant 0 : index
    %35 = vector.load %arg14[%c0_33, %c0_34] : memref<40x1xf32, #tpu.memory_space<vmem>>, vector<40x1xf32>
    %36 = vector.broadcast %35 : vector<40x1xf32> to vector<40x256xf32>
    %37 = arith.addf %34, %36 : vector<40x256xf32>
    %cst_35 = arith.constant 0.000000e+00 : f32
    %38 = vector.broadcast %cst_35 : f32 to vector<40x256xf32>
    %39 = arith.maximumf %37, %38 : vector<40x256xf32>
    %c0_36 = arith.constant 0 : index
    %c0_37 = arith.constant 0 : index
    %40 = vector.load %arg15[%c0_36, %c0_37] : memref<64x40xf32, #tpu.memory_space<vmem>>, vector<64x40xf32>
    %cst_38 = arith.constant dense<0.000000e+00> : vector<64x256xf32>
    %41 = tpu.matmul %40, %39, %cst_38 {dimension_numbers = #tpu.dot_dimension_numbers<[1], [0], [0], [1], [0, 0, 1, 1], [], []>} : vector<64x40xf32>, vector<40x256xf32>, vector<64x256xf32> -> vector<64x256xf32>
    %c0_39 = arith.constant 0 : index
    %c0_40 = arith.constant 0 : index
    %42 = vector.load %arg16[%c0_39, %c0_40] : memref<64x16xf32, #tpu.memory_space<vmem>>, vector<64x16xf32>
    %cst_41 = arith.constant dense<0.000000e+00> : vector<64x256xf32>
    %43 = tpu.matmul %42, %15, %cst_41 {dimension_numbers = #tpu.dot_dimension_numbers<[1], [0], [0], [1], [0, 0, 1, 1], [], []>} : vector<64x16xf32>, vector<16x256xf32>, vector<64x256xf32> -> vector<64x256xf32>
    %44 = arith.addf %41, %43 : vector<64x256xf32>
    %c0_42 = arith.constant 0 : index
    %c0_43 = arith.constant 0 : index
    %45 = vector.load %arg17[%c0_42, %c0_43] : memref<64x8xf32, #tpu.memory_space<vmem>>, vector<64x8xf32>
    %cst_44 = arith.constant dense<0.000000e+00> : vector<64x256xf32>
    %46 = tpu.matmul %45, %3, %cst_44 {dimension_numbers = #tpu.dot_dimension_numbers<[1], [0], [0], [1], [0, 0, 1, 1], [], []>} : vector<64x8xf32>, vector<8x256xf32>, vector<64x256xf32> -> vector<64x256xf32>
    %47 = arith.addf %44, %46 : vector<64x256xf32>
    %c0_45 = arith.constant 0 : index
    %c0_46 = arith.constant 0 : index
    %48 = vector.load %arg18[%c0_45, %c0_46] : memref<64x1xf32, #tpu.memory_space<vmem>>, vector<64x1xf32>
    %49 = vector.broadcast %48 : vector<64x1xf32> to vector<64x256xf32>
    %50 = arith.addf %47, %49 : vector<64x256xf32>
    %cst_47 = arith.constant 0.000000e+00 : f32
    %51 = vector.broadcast %cst_47 : f32 to vector<64x256xf32>
    %52 = arith.maximumf %50, %51 : vector<64x256xf32>
    %c0_48 = arith.constant 0 : index
    %c0_49 = arith.constant 0 : index
    %53 = vector.load %arg19[%c0_48, %c0_49] : memref<16x64xf32, #tpu.memory_space<vmem>>, vector<16x64xf32>
    %cst_50 = arith.constant dense<0.000000e+00> : vector<16x256xf32>
    %54 = tpu.matmul %53, %52, %cst_50 {dimension_numbers = #tpu.dot_dimension_numbers<[1], [0], [0], [1], [0, 0, 1, 1], [], []>} : vector<16x64xf32>, vector<64x256xf32>, vector<16x256xf32> -> vector<16x256xf32>
    %c0_51 = arith.constant 0 : index
    %c0_52 = arith.constant 0 : index
    %55 = vector.load %arg20[%c0_51, %c0_52] : memref<16x1xf32, #tpu.memory_space<vmem>>, vector<16x1xf32>
    %56 = vector.broadcast %55 : vector<16x1xf32> to vector<16x256xf32>
    %57 = arith.addf %54, %56 : vector<16x256xf32>
    %c0_53 = arith.constant 0 : index
    %c0_54 = arith.constant 0 : index
    %c0_55 = arith.constant 0 : index
    %58 = vector.load %arg21[%c0_53, %c0_54, %c0_55] : memref<1x16x256xf32, #tpu.memory_space<vmem>>, vector<1x16x256xf32>
    %59 = vector.shape_cast %58 : vector<1x16x256xf32> to vector<16x256xf32>
    %60 = vector.shape_cast %57 : vector<16x256xf32> to vector<1x16x256xf32>
    tpu.vector_store %arg21[%c0_53, %c0_54, %c0_55], %60 {strides = array<i32>} : memref<1x16x256xf32, #tpu.memory_space<vmem>>, vector<1x16x256xf32>,
    return
  }
  func.func @transform_0(%arg0: i32, %arg1: i32) -> (i32, i32, i32) {
    %c0_i32 = arith.constant 0 : i32
    %c0_i32_0 = arith.constant 0 : i32
    return %arg0, %c0_i32, %arg1 : i32, i32, i32
  }
  func.func @transform_1(%arg0: i32, %arg1: i32) -> (i32, i32, i32) {
    %c0_i32 = arith.constant 0 : i32
    %c0_i32_0 = arith.constant 0 : i32
    return %arg0, %c0_i32, %arg1 : i32, i32, i32
  }
  func.func @transform_2(%arg0: i32, %arg1: i32) -> (i32, i32) {
    %c0_i32 = arith.constant 0 : i32
    %c0_i32_0 = arith.constant 0 : i32
    %c0_i32_1 = arith.constant 0 : i32
    return %c0_i32, %c0_i32_0 : i32, i32
  }
  func.func @transform_3(%arg0: i32, %arg1: i32) -> (i32, i32) {
    %c0_i32 = arith.constant 0 : i32
    %c0_i32_0 = arith.constant 0 : i32
    %c0_i32_1 = arith.constant 0 : i32
    return %c0_i32, %c0_i32_0 : i32, i32
  }
  func.func @transform_4(%arg0: i32, %arg1: i32) -> (i32, i32) {
    %c0_i32 = arith.constant 0 : i32
    %c0_i32_0 = arith.constant 0 : i32
    %c0_i32_1 = arith.constant 0 : i32
    return %c0_i32, %c0_i32_0 : i32, i32
  }
  func.func @transform_5(%arg0: i32, %arg1: i32) -> (i32, i32) {
    %c0_i32 = arith.constant 0 : i32
    %c0_i32_0 = arith.constant 0 : i32
    %c0_i32_1 = arith.constant 0 : i32
    return %c0_i32, %c0_i32_0 : i32, i32
  }
  func.func @transform_6(%arg0: i32, %arg1: i32) -> (i32, i32) {
    %c0_i32 = arith.constant 0 : i32
    %c0_i32_0 = arith.constant 0 : i32
    %c0_i32_1 = arith.constant 0 : i32
    return %c0_i32, %c0_i32_0 : i32, i32
  }
  func.func @transform_7(%arg0: i32, %arg1: i32) -> (i32, i32) {
    %c0_i32 = arith.constant 0 : i32
    %c0_i32_0 = arith.constant 0 : i32
    %c0_i32_1 = arith.constant 0 : i32
    return %c0_i32, %c0_i32_0 : i32, i32
  }
  func.func @transform_8(%arg0: i32, %arg1: i32) -> (i32, i32) {
    %c0_i32 = arith.constant 0 : i32
    %c0_i32_0 = arith.constant 0 : i32
    %c0_i32_1 = arith.constant 0 : i32
    return %c0_i32, %c0_i32_0 : i32, i32
  }
  func.func @transform_9(%arg0: i32, %arg1: i32) -> (i32, i32) {
    %c0_i32 = arith.constant 0 : i32
    %c0_i32_0 = arith.constant 0 : i32
    %c0_i32_1 = arith.constant 0 : i32
    return %c0_i32, %c0_i32_0 : i32, i32
  }
  func.func @transform_10(%arg0: i32, %arg1: i32) -> (i32, i32) {
    %c0_i32 = arith.constant 0 : i32
    %c0_i32_0 = arith.constant 0 : i32
    %c0_i32_1 = arith.constant 0 : i32
    return %c0_i32, %c0_i32_0 : i32, i32
  }
  func.func @transform_11(%arg0: i32, %arg1: i32) -> (i32, i32) {
    %c0_i32 = arith.constant 0 : i32
    %c0_i32_0 = arith.constant 0 : i32
    %c0_i32_1 = arith.constant 0 : i32
    return %c0_i32, %c0_i32_0 : i32, i32
  }
  func.func @transform_12(%arg0: i32, %arg1: i32) -> (i32, i32) {
    %c0_i32 = arith.constant 0 : i32
    %c0_i32_0 = arith.constant 0 : i32
    %c0_i32_1 = arith.constant 0 : i32
    return %c0_i32, %c0_i32_0 : i32, i32
  }
  func.func @transform_13(%arg0: i32, %arg1: i32) -> (i32, i32) {
    %c0_i32 = arith.constant 0 : i32
    %c0_i32_0 = arith.constant 0 : i32
    %c0_i32_1 = arith.constant 0 : i32
    return %c0_i32, %c0_i32_0 : i32, i32
  }
  func.func @transform_14(%arg0: i32, %arg1: i32) -> (i32, i32) {
    %c0_i32 = arith.constant 0 : i32
    %c0_i32_0 = arith.constant 0 : i32
    %c0_i32_1 = arith.constant 0 : i32
    return %c0_i32, %c0_i32_0 : i32, i32
  }
  func.func @transform_15(%arg0: i32, %arg1: i32) -> (i32, i32) {
    %c0_i32 = arith.constant 0 : i32
    %c0_i32_0 = arith.constant 0 : i32
    %c0_i32_1 = arith.constant 0 : i32
    return %c0_i32, %c0_i32_0 : i32, i32
  }
  func.func @transform_16(%arg0: i32, %arg1: i32) -> (i32, i32) {
    %c0_i32 = arith.constant 0 : i32
    %c0_i32_0 = arith.constant 0 : i32
    %c0_i32_1 = arith.constant 0 : i32
    return %c0_i32, %c0_i32_0 : i32, i32
  }
  func.func @transform_17(%arg0: i32, %arg1: i32) -> (i32, i32) {
    %c0_i32 = arith.constant 0 : i32
    %c0_i32_0 = arith.constant 0 : i32
    %c0_i32_1 = arith.constant 0 : i32
    return %c0_i32, %c0_i32_0 : i32, i32
  }
  func.func @transform_18(%arg0: i32, %arg1: i32) -> (i32, i32) {
    %c0_i32 = arith.constant 0 : i32
    %c0_i32_0 = arith.constant 0 : i32
    %c0_i32_1 = arith.constant 0 : i32
    return %c0_i32, %c0_i32_0 : i32, i32
  }
  func.func @transform_19(%arg0: i32, %arg1: i32) -> (i32, i32, i32) {
    %c0_i32 = arith.constant 0 : i32
    %c0_i32_0 = arith.constant 0 : i32
    return %arg0, %c0_i32, %arg1 : i32, i32, i32
  }
}

</mosaic_0001>

<bundles_post_ra>
// kernel: tpu_custom_call.1
= control target key start
LH: loop header
LB: loop body
LE: loop exit
PB: predicated region body
PF: predicated region fallthrough
CT: control target
= control target key end

     0   :  { %s3581_s0 = inlined_call_operand.vmem [shape: f32[2,3,512], index: 0, kind: input, shape index: {}]   ;;  %s3582_s1 = inlined_call_operand.vmem [shape: f32[2,8,512], index: 1, kind: input, shape index: {}]   ;;  %s3583_s2 = inlined_call_operand.vmem [shape: f32[64,3], index: 2, kind: input, shape index: {}]   ;;  %s3584_s3 = inlined_call_operand.vmem [shape: f32[64,1], index: 3, kind: input, shape index: {}]   ;;  %s3585_s4 = inlined_call_operand.vmem [shape: f32[16,64], index: 4, kind: input, shape index: {}]   ;;  %s3586_s5 = inlined_call_operand.vmem [shape: f32[16,1], index: 5, kind: input, shape index: {}]   ;;  %s3587_s6 = inlined_call_operand.vmem [shape: f32[64,16], index: 6, kind: input, shape index: {}]   ;;  %s3588_s7 = inlined_call_operand.vmem [shape: f32[64,8], index: 7, kind: input, shape index: {}]   ;;  %s3589_s8 = inlined_call_operand.vmem [shape: f32[64,1], index: 8, kind: input, shape index: {}]   ;;  %s3590_s9 = inlined_call_operand.vmem [shape: f32[64,64], index: 9, kind: input, shape index: {}]   ;;  %s3591_s10 = inlined_call_operand.vmem [shape: f32[64,1], index: 10, kind: input, shape index: {}]   ;;  %s3592_s11 = inlined_call_operand.vmem [shape: f32[40,64], index: 11, kind: input, shape index: {}]   ;;  %s3593_s12 = inlined_call_operand.vmem [shape: f32[40,1], index: 12, kind: input, shape index: {}]   ;;  %s3594_s13 = inlined_call_operand.vmem [shape: f32[64,40], index: 13, kind: input, shape index: {}]   ;;  %s3595_s14 = inlined_call_operand.vmem [shape: f32[64,16], index: 14, kind: input, shape index: {}]   ;;  %s3596_s15 = inlined_call_operand.vmem [shape: f32[64,8], index: 15, kind: input, shape index: {}]   ;;  %s3597_s16 = inlined_call_operand.vmem [shape: f32[64,1], index: 16, kind: input, shape index: {}]   ;;  %s3598_s17 = inlined_call_operand.vmem [shape: f32[16,64], index: 17, kind: input, shape index: {}]   ;;  %s3599_s18 = inlined_call_operand.vmem [shape: f32[16,1], index: 18, kind: input, shape index: {}]   ;;  %s3600_s19 = inlined_call_operand.hbm [shape: f32[2,16,512], index: 19, kind: output, shape index: {}]  }
   0x1   :  { %3618 = sst [smem:[#allocation16_spill]] %s3581_s0 }
   0x2   :  { %3619 = sst [smem:[#allocation17_spill]] %s3582_s1 }
   0x3   :  { %3620 = sst [smem:[#allocation18_spill]] %s3583_s2 }
   0x4   :  { %3621 = sst [smem:[#allocation19_spill]] %s3584_s3 }
   0x5   :  { %3622 = sst [smem:[#allocation20_spill]] %s3598_s17 }
   0x6   :  { %3623 = sst [smem:[#allocation21_spill]] %s3600_s19 }
   0x7   :  { %24 = vsyncpa [#allocation3], 0 }
   0x8   :  { %26 = vsyncpa [#allocation3 + $0x1], 0  ;;  %s2967_s0 = smov 0   ;;  %s2969_s30 = smov 0  }
   0x9   :  { %s2971_s20 = smov 0   ;;  %s2973_s21 = smov 0  }
   0xa   :  { %s2975_s1 = smov 0   ;;  %s2977_s22 = smov 0  }
   0xb   :  { %s2979_s2 = smov 0   ;;  %s2981_s23 = smov 0  }
   0xc LB: > { %3624 = sst [smem:[#allocation5_spill]] %s2831_s0  ;;  %s2471_s24 = sadd.s32 4294967295, %s2859_s23   ;;  %s2859_s23 = sphi %s2981_s23, %s32_s23   ;;  %s2855_s2 = sphi %s2979_s2, %s3654_s2   ;;  %s2851_s22 = sphi %s2977_s22, %s3653_s22   ;;  %s2847_s1 = sphi %s2975_s1, %s3652_s1   ;;  %s2843_s21 = sphi %s2973_s21, %s3651_s21   ;;  %s2839_s20 = sphi %s2971_s20, %s3650_s20   ;;  %s2835_s30 = sphi %s2969_s30, %s3656_s30   ;;  %s2831_s0 = sphi %s2967_s0, %s3655_s0  }
   0xd   : > { %3625 = sst [smem:[#allocation6_spill]] %s2839_s20  ;;  %s2472_s25 = sadd.s32 4294967294, %s2859_s23  }
   0xe   : > { %3626 = sst [smem:[#allocation7_spill]] %s2851_s22  ;;  %s41_s3 = sadd.s32 1, %s2851_s22 }
   0xf   : > { %3627 = sst [smem:[#allocation8_spill]] %s2855_s2  ;;  %p42_p0 = scmp.ge.s32.totalorder %s41_s3, 2 }
  0x10   : > { %3628 = sst [smem:[#allocation9_spill]] %s2859_s23  ;;  %s44_s26 = sadd.s32 1, %s2855_s2 }
  0x11   : > { %p476_p1 = scmp.ne.s32.totalorder %s2839_s20, %s2835_s30  ;;  %p477_p2 = scmp.eq.s32.totalorder %s2471_s24, 3 }
  0x12   : > { %s3658_s3 = smov (%p42_p0, %s41_s3), 0  ;;  %s3660_s26 = smov (!%p42_p0, %s44_s26), %s2855_s2 }
  0x13   : > { %3629 = sst [smem:[#allocation10_spill]] %s3658_s3  ;;  %s462_s27 = ssub.s32 %s2851_s22, %s3658_s3 }
  0x14   : > { %p3018_p3 = por %p477_p2, %p476_p1  ;;  %p46_p4 = scmp.ge.s32.totalorder %s3660_s26, 2 }
  0x15   : > { %p482_p5 = scmp.ne.s32.totalorder %s2835_s30, %s2831_s0  ;;  %p483_p6 = scmp.eq.s32.totalorder %s2472_s25, 3 }
  0x16   : > { %s3630_s28 = scalar_select %p3018_p3, 1, 0 }
  0x17   : > { %p2475_p7 = scmp.ge.s32.totalorder %s2859_s23, 1  ;;  %s3662_s26 = smov (%p46_p4, %s3660_s26), 0 }
  0x18   : > { %3631 = sst [smem:[#allocation11_spill]] %s3630_s28  ;;  %p3027_p8 = por %p483_p6, %p482_p5 }
  0x19   : > { %3632 = sst [smem:[#allocation12_spill]] %s3662_s26  ;;  %p578_p9 = scmp.lt.s32.totalorder %s2859_s23, 5 }
  0x1a   : > { %s3633_s29 = scalar_select %p3027_p8, 1, 0 }
  0x1b   : > { %s461_s24 = ssub.s32 %s2855_s2, %s3662_s26  ;;  %s466_s19 = sadd.s32 1, %s2839_s20 }
  0x1c   : > { %3634 = sst [smem:[#allocation13_spill]] %s3633_s29  ;;  %s463_s17 = sor.u32 %s462_s27, %s461_s24 }
  0x1d   : > { %p579_p10 = pnand %p2475_p7, %p578_p9  ;;  %p464_p11 = scmp.eq.s32.totalorder %s463_s17, 0 }
  0x1f   : > { %s3036_s3 = scalar_select %p464_p11, %s2839_s20, %s466_s19  }
  0x20   : > { %582 = sbr.rel (%p579_p10) target bundleno = 1781 (0x6f5), region = 96 }
  0x21   : > { %3635 = sst [smem:[#allocation14_spill]] %s3036_s3 }
  0x27   : > { %s3039_s25 = sshll.u32 %s2843_s21, 1  ;;  %p648_p12 = scmp.lt.s32.totalorder %s2847_s1, 1  ;;  %v2861_v0 = vmov 0.0   ;;  %v2862_v1 = vmov 0   ;;  %vm754_vm0 = vcmask 1042432   ;;  %vm729_vm1 = vcmask 23552  }
  0x28   : > { %3636 = sst [smem:[#allocation15_spill]] %s3039_s25  ;;  %p650_p13 = scmp.lt.s32.totalorder %s3039_s25, 3  ;;  %823 = vmatprep.mubr.f32.mxu0 %v2861_v0  ;;  %847 = vmatprep.mubr.f32.mxu1 %v2861_v0  ;;  %v890_v18 = vld [vmem:[%s3586_s5] sm:$0xff]  ;;  %v891_v19 = vld [vmem:[%s3586_s5 + $0x8] sm:$0xff]  ;;  %v1280_v24 = vld [vmem:[%s3589_s8 + $0x10] sm:$0xff]  ;;  %vm902_vm2 = vcmask 523264  }
  0x29   : > { %s649_s27 = scalar_select %p648_p12, %s2847_s1, 1  ;;  %2762 = vset.pattern.permute.xlu0 %v2862_v1  ;;  %2763 = vset.pattern.permute.xlu1 %v2862_v1  ;;  %v1278_v22 = vld [vmem:[%s3589_s8] sm:$0xff]  ;;  %v1279_v23 = vld [vmem:[%s3589_s8 + $0x8] sm:$0xff]  ;;  %v1281_v25 = vld [vmem:[%s3589_s8 + $0x18] sm:$0xff]  ;;  %vm1002_vm3 = vcmask 64512   ;;  %vm1140_vm4 = vcmask 130048  }
  0x2a   : > { %s3637_s24 = sld [smem:[#allocation19_spill]]  ;;  %s3639_s2 = sld [smem:[#allocation18_spill]]  ;;  %v1282_v26 = vld [vmem:[%s3589_s8 + $0x20] sm:$0xff]  ;;  %v1283_v27 = vld [vmem:[%s3589_s8 + $0x28] sm:$0xff]  ;;  %v1284_v28 = vld [vmem:[%s3589_s8 + $0x30] sm:$0xff]  ;;  %vm1875_vm5 = vcmask 326656  }
  0x2b   : > { %s651_s26 = scalar_select %p650_p13, %s3039_s25, 3  ;;  %v1285_v29 = vld [vmem:[%s3589_s8 + $0x38] sm:$0xff]  ;;  %v1366_v30 = vld [vmem:[%s3591_s10] sm:$0xff]  ;;  %v1367_v31 = vld [vmem:[%s3591_s10 + $0x8] sm:$0xff] }
  0x2c   : > { %s2478_s21 = sshll.u32 %s649_s27, 2  ;;  %s3638_s27 = sld [smem:[#allocation16_spill]]  ;;  %v1368_v32 = vld [vmem:[%s3591_s10 + $0x10] sm:$0xff]  ;;  %v1369_v33 = vld [vmem:[%s3591_s10 + $0x18] sm:$0xff]  ;;  %v1370_v34 = vld [vmem:[%s3591_s10 + $0x20] sm:$0xff] }
  0x2d   : > { %s3056_s29 = sadd.s32 %s2478_s21, %s651_s26  ;;  %v1371_v35 = vld [vmem:[%s3591_s10 + $0x28] sm:$0xff]  ;;  %v1372_v36 = vld [vmem:[%s3591_s10 + $0x30] sm:$0xff]  ;;  %v1373_v37 = vld [vmem:[%s3591_s10 + $0x38] sm:$0xff]  ;;  %s3641_s19 = sld [smem:[#allocation17_spill]] }
  0x2e   : > { %s2479_s0 = sshll.u32 %s3056_s29, 2  ;;  %v1572_v38 = vld [vmem:[%s3593_s12] sm:$0xff]  ;;  %v1573_v39 = vld [vmem:[%s3593_s12 + $0x8] sm:$0xff]  ;;  %v1574_v40 = vld [vmem:[%s3593_s12 + $0x10] sm:$0xff]  ;;  %s2482_s28 = sshll.u32 %s3056_s29, 3 }
  0x2f   : > { %v1575_v41 = vld [vmem:[%s3593_s12 + $0x18] sm:$0xff]  ;;  %v1576_v42 = vld [vmem:[%s3593_s12 + $0x20] sm:$0xff]  ;;  %v2175_v44 = vld [vmem:[%s3597_s16 + $0x8] sm:$0xff]  ;;  %s3642_s23 = sld [smem:[#allocation15_spill]]  ;;  %s2552_s20 = sshll.u32 %s2847_s1, 3 }
  0x30   : > { %v679_v2 = vld [vmem:[%s3637_s24] sm:$0xff]  ;;  %v680_v3 = vld [vmem:[%s3637_s24 + $0x8] sm:$0xff]  ;;  %v681_v4 = vld [vmem:[%s3637_s24 + $0x10] sm:$0xff]  ;;  %s3640_s3 = smov %s3639_s2  ;;  %s3645_s17 = sld [smem:[#allocation21_spill]] }
  0x31   : > { %689 = vperm.xlu0 %2762, %v679_v2   ;;  %699 = vperm.xlu1 %2763, %v681_v4   ;;  %v682_v5 = vld [vmem:[%s3637_s24 + $0x18] sm:$0xff]  ;;  %v671_v8 = vld [vmem:[%s3639_s2] sm:$0xff]  ;;  %v684_v11 = vld [vmem:[%s3637_s24 + $0x28] sm:$0xff] }
  0x32   : > { %s655_s25 = scalar_lea.vmem %s3638_s27, %s2479_s0  ;;  %v675_v9 = vld [vmem:[%s3640_s3 + $0x20] sm:$0xff]  ;;  %v672_v12 = vld [vmem:[%s3640_s3 + $0x8] sm:$0xff]  ;;  %v685_v14 = vld [vmem:[%s3637_s24 + $0x30] sm:$0xff] }
  0x33   : > { %v668_v6 = vld [vmem:[%s655_s25] sm:$0x77]  ;;  %v676_v13 = vld [vmem:[%s3640_s3 + $0x28] sm:$0xff]  ;;  %v686_v15 = vld [vmem:[%s3637_s24 + $0x38] sm:$0xff]  ;;  %s665_s27 = scalar_lea.vmem %s3641_s19, %s2482_s28  ;;  %s3643_s25 = sld [smem:[#allocation20_spill]] }
  0x34   : > { %v728_v7 = vcombine.high %v668_v6, %v668_v6  ;;  %v683_v10 = vld [vmem:[%s3637_s24 + $0x20] sm:$0xff]  ;;  %v673_v16 = vld [vmem:[%s3640_s3 + $0x10] sm:$0xff]  ;;  %v674_v20 = vld [vmem:[%s3640_s3 + $0x18] sm:$0xff] }
  0x35   : > { %694 = vperm.xlu0 %2762, %v680_v3   ;;  %704 = vperm.xlu1 %2763, %v682_v5   ;;  %v677_v17 = vld [vmem:[%s3640_s3 + $0x30] sm:$0xff]  ;;  %v678_v21 = vld [vmem:[%s3640_s3 + $0x38] sm:$0xff]  ;;  %v2174_v43 = vld [vmem:[%s3597_s16] sm:$0xff]  ;;  %s2368_s29 = sadd.s32 %s2552_s20, %s3642_s23  ;;  %s2863_s3 = smov [#allocation2]  }
  0x36   : > { %2483 = vmatprep.subr.msk.mxu0 %vm754_vm0, %v728_v7  ;;  %2636 = vmatprep.subr.msk.mxu1 %vm754_vm0, %v728_v7  ;;  %v2176_v45 = vld [vmem:[%s3597_s16 + $0x10] sm:$0xff]  ;;  %v2177_v46 = vld [vmem:[%s3597_s16 + $0x18] sm:$0xff]  ;;  %v2178_v47 = vld [vmem:[%s3597_s16 + $0x20] sm:$0xff]  ;;  %s2553_s2 = sshll.u32 %s2368_s29, 7  ;;  %s2769_s20 = sshll.u32 %s2863_s3, 4  ;;  %s2770_s20 = int_to_ptr.vmem [resolvable:$false] %s2769_s20 }
  0x37   : > { %2484 = vmatpush1.msk.msra.mxu0 %vm754_vm0, %v668_v6  ;;  %2637 = vmatpush1.msk.msra.mxu1 %vm754_vm0, %v668_v6  ;;  %v2179_v48 = vld [vmem:[%s3597_s16 + $0x28] sm:$0xff]  ;;  %v2180_v49 = vld [vmem:[%s3597_s16 + $0x30] sm:$0xff]  ;;  %v2181_v50 = vld [vmem:[%s3597_s16 + $0x38] sm:$0xff]  ;;  %s3525_s19 = scalar_lea.hbm %s3645_s17, %s2553_s2 }
  0x38   : > { %2485 = vmatmul.mubr.msk.f32.vlgmr.msra.gmra.mrb[0].mxu0 %vm729_vm1, %v671_v8  ;;  %2489 = vmatmul.mubr.msk.f32.vlgmr.msra.gmra.mrb[0].mxu1 %vm729_vm1, %v675_v9  ;;  %v2256_v51 = vld [vmem:[%s3599_s18] sm:$0xff]  ;;  %v2257_v52 = vld [vmem:[%s3599_s18 + $0x8] sm:$0xff] }
  0x39   : > { %829 = vmatprep.mubr.f32.mxu0 %v2861_v0  ;;  %853 = vmatprep.mubr.f32.mxu1 %v2861_v0 }
  0x3a   : > { %709 = vperm.xlu0 %2762, %v683_v10   ;;  %714 = vperm.xlu1 %2763, %v684_v11  }
  0x3c   : > { %2486 = vmatmul.mubr.msk.f32.gmra.mrb[2].mxu0 %vm729_vm1, %v672_v12  ;;  %2490 = vmatmul.mubr.msk.f32.gmra.mrb[2].mxu1 %vm729_vm1, %v676_v13 }
  0x3d   : > { %835 = vmatprep.mubr.f32.mxu0 %v2861_v0  ;;  %859 = vmatprep.mubr.f32.mxu1 %v2861_v0 }
  0x3e   : > { %719 = vperm.xlu0 %2762, %v685_v14   ;;  %724 = vperm.xlu1 %2763, %v686_v15  }
  0x40   : > { %2487 = vmatmul.mubr.msk.f32.gmra.mrb[4].mxu0 %vm729_vm1, %v673_v16  ;;  %2491 = vmatmul.mubr.msk.f32.gmra.mrb[4].mxu1 %vm729_vm1, %v677_v17 }
  0x41   : > { %841 = vmatprep.mubr.f32.mxu0 %v2861_v0  ;;  %865 = vmatprep.mubr.f32.mxu1 %v2861_v0 }
  0x42   : > { %894 = vperm.xlu0 %2762, %v890_v18   ;;  %899 = vperm.xlu1 %2763, %v891_v19  }
  0x44   : > { %2488 = vmatmul.mubr.msk.f32.gmra.mrb[6].mxu0 %vm729_vm1, %v674_v20  ;;  %2492 = vmatmul.mubr.msk.f32.gmra.mrb[6].mxu1 %vm729_vm1, %v678_v21 }
  0x45   : > { %973 = vmatprep.mubr.f32.mxu1 %v2861_v0  ;;  %1681 = vmatprep.mubr.f32.mxu0 %v2861_v0 }
  0x46   : > { %1288 = vperm.xlu0 %2762, %v1278_v22   ;;  %1293 = vperm.xlu1 %2763, %v1279_v23  }
  0x4a   : > { %1298 = vperm.xlu0 %2762, %v1280_v24   ;;  %1303 = vperm.xlu1 %2763, %v1281_v25  }
  0x4e   : > { %1308 = vperm.xlu0 %2762, %v1282_v26   ;;  %1313 = vperm.xlu1 %2763, %v1283_v27  }
  0x52   : > { %1318 = vperm.xlu0 %2762, %v1284_v28   ;;  %1323 = vperm.xlu1 %2763, %v1285_v29  }
  0x56   : > { %1376 = vperm.xlu0 %2762, %v1366_v30   ;;  %1381 = vperm.xlu1 %2763, %v1367_v31  }
  0x5a   : > { %1386 = vperm.xlu0 %2762, %v1368_v32   ;;  %1391 = vperm.xlu1 %2763, %v1369_v33  }
  0x5e   : > { %1396 = vperm.xlu0 %2762, %v1370_v34   ;;  %1401 = vperm.xlu1 %2763, %v1371_v35  }
  0x62   : > { %1406 = vperm.xlu0 %2762, %v1372_v36   ;;  %1411 = vperm.xlu1 %2763, %v1373_v37  }
  0x66   : > { %1579 = vperm.xlu0 %2762, %v1572_v38   ;;  %1584 = vperm.xlu1 %2763, %v1573_v39  }
  0x6a   : > { %1589 = vperm.xlu0 %2762, %v1574_v40   ;;  %1594 = vperm.xlu1 %2763, %v1575_v41  }
  0x6e   : > { %1599 = vperm.xlu0 %2762, %v1576_v42   ;;  %2184 = vperm.xlu1 %2763, %v2174_v43  }
  0x72   : > { %2189 = vperm.xlu0 %2762, %v2175_v44   ;;  %2194 = vperm.xlu1 %2763, %v2176_v45  }
  0x76   : > { %2199 = vperm.xlu0 %2762, %v2177_v46   ;;  %2204 = vperm.xlu1 %2763, %v2178_v47  }
  0x7a   : > { %2209 = vperm.xlu0 %2762, %v2179_v48   ;;  %2214 = vperm.xlu1 %2763, %v2180_v49  }
  0x7e   : > { %2219 = vperm.xlu0 %2762, %v2181_v50   ;;  %2260 = vperm.xlu1 %2763, %v2256_v51  }
  0x82   : > { %2265 = vperm.xlu0 %2762, %v2257_v52  }
  0xb0   : > { %v690_v53 = vpop.permute.xlu0 %689  ;;  %v700_v54 = vpop.permute.xlu1 %699 }
  0xb4   : > { %v695_v55 = vpop.permute.xlu0 %694  ;;  %v705_v56 = vpop.permute.xlu1 %704 }
  0xb9   : > { %v710_v57 = vpop.permute.xlu0 %709  ;;  %v715_v1 = vpop.permute.xlu1 %714 }
  0xbd   : > { %v720_v26 = vpop.permute.xlu0 %719  ;;  %v725_v29 = vpop.permute.xlu1 %724 }
 0x10b   : > { %v825_v58 = vpop.f32.mrb[0].mxu0  ;;  %v849_v59 = vpop.f32.mrb[0].mxu1 }
 0x10c   : > { %v827_v60 = vpop.f32.mrb[1].mxu0  ;;  %v850_v61 = vadd.f32 %v849_v59, %v710_v57  ;;  %v851_v62 = vpop.f32.mrb[1].mxu1  ;;  %v826_v2 = vadd.f32 %v825_v58, %v690_v53  ;;  %v994_v58 = vld [vmem:[%s3588_s7] sm:$0xff]  ;;  %v995_v59 = vld [vmem:[%s3588_s7 + $0x8] sm:$0xff] }
 0x10d   : > { %v852_v63 = vadd.f32 %v851_v62, %v710_v57  ;;  %v828_v3 = vadd.f32 %v827_v60, %v690_v53  ;;  %v889_v57 = vld [vmem:[%s3585_s4 + $0x8] sm:$0xff]  ;;  %v996_v60 = vld [vmem:[%s3588_s7 + $0x10] sm:$0xff]  ;;  %v998_v62 = vld [vmem:[%s3588_s7 + $0x20] sm:$0xff] }
 0x10e   : > { %v880_v6 = vmax.f32 %v850_v61, 0.0  ;;  %v872_v14 = vmax.f32 %v826_v2, 0.0  ;;  %v997_v61 = vld [vmem:[%s3588_s7 + $0x18] sm:$0xff] }
 0x10f   : > { %v831_v4 = vpop.f32.mrb[2].mxu0  ;;  %v855_v5 = vpop.f32.mrb[2].mxu1  ;;  %v881_v11 = vmax.f32 %v852_v63, 0.0  ;;  %v873_v17 = vmax.f32 %v828_v3, 0.0  ;;  %v999_v63 = vld [vmem:[%s3588_s7 + $0x28] sm:$0xff]  ;;  %v1001_v2 = vld [vmem:[%s3588_s7 + $0x38] sm:$0xff] }
 0x110   : > { %v832_v7 = vadd.f32 %v831_v4, %v695_v55  ;;  %v856_v8 = vadd.f32 %v855_v5, %v715_v1  ;;  %v833_v9 = vpop.f32.mrb[3].mxu0  ;;  %v857_v10 = vpop.f32.mrb[3].mxu1 }
 0x111   : > { %v834_v12 = vadd.f32 %v833_v9, %v695_v55  ;;  %v858_v13 = vadd.f32 %v857_v10, %v715_v1  ;;  %v888_v55 = vld [vmem:[%s3585_s4] sm:$0xff]  ;;  %v1000_v1 = vld [vmem:[%s3588_s7 + $0x30] sm:$0xff]  ;;  %v895_v5 = vpop.permute.xlu0 %894 }
 0x112   : > { %v874_v15 = vmax.f32 %v832_v7, 0.0  ;;  %v882_v16 = vmax.f32 %v856_v8, 0.0 }
 0x113   : > { %v875_v18 = vmax.f32 %v834_v12, 0.0  ;;  %v883_v19 = vmax.f32 %v858_v13, 0.0  ;;  %v837_v20 = vpop.f32.mrb[4].mxu0  ;;  %v861_v21 = vpop.f32.mrb[4].mxu1 }
 0x114   : > { %v2558_v22 = vpack.c.bf16 %v874_v15, %v872_v14  ;;  %v2566_v23 = vpack.c.bf16 %v882_v16, %v880_v6  ;;  %v839_v24 = vpop.f32.mrb[5].mxu0  ;;  %v863_v25 = vpop.f32.mrb[5].mxu1  ;;  %v838_v30 = vadd.f32 %v837_v20, %v700_v54  ;;  %v862_v31 = vadd.f32 %v861_v21, %v720_v26  ;;  %v986_v15 = vld [vmem:[%s3587_s6] sm:$0xff]  ;;  %v987_v16 = vld [vmem:[%s3587_s6 + $0x8] sm:$0xff]  ;;  %v992_v21 = vld [vmem:[%s3587_s6 + $0x30] sm:$0xff] }
 0x115   : > { %v2556_v27 = vpack.c.bf16 %v875_v18, %v873_v17  ;;  %v2564_v28 = vpack.c.bf16 %v883_v19, %v881_v11  ;;  %v840_v32 = vadd.f32 %v839_v24, %v700_v54  ;;  %v864_v33 = vadd.f32 %v863_v25, %v720_v26  ;;  %v3220_v54 = vld [vmem:[%s665_s27 + $0x8] sm:$0xff]  ;;  %v900_v6 = vpop.permute.xlu1 %899  ;;  %v988_v17 = vld [vmem:[%s3587_s6 + $0x10] sm:$0xff]  ;;  %v989_v18 = vld [vmem:[%s3587_s6 + $0x18] sm:$0xff]  ;;  %v1289_v25 = vpop.permute.xlu0 %1288 }
 0x116   : > { %v876_v42 = vmax.f32 %v838_v30, 0.0  ;;  %v884_v43 = vmax.f32 %v862_v31, 0.0  ;;  %v990_v19 = vld [vmem:[%s3587_s6 + $0x20] sm:$0xff]  ;;  %v991_v20 = vld [vmem:[%s3587_s6 + $0x28] sm:$0xff] }
 0x117   : > { %v843_v34 = vpop.f32.mrb[6].mxu0  ;;  %v867_v35 = vpop.f32.mrb[6].mxu1  ;;  %2557 = vmatprep.subr.bf16.mxu1 %v2556_v27  ;;  %v877_v46 = vmax.f32 %v840_v32, 0.0  ;;  %v885_v47 = vmax.f32 %v864_v33, 0.0 }
 0x118   : > { %v844_v36 = vadd.f32 %v843_v34, %v705_v56  ;;  %v868_v37 = vadd.f32 %v867_v35, %v725_v29  ;;  %v845_v38 = vpop.f32.mrb[7].mxu0  ;;  %v869_v39 = vpop.f32.mrb[7].mxu1  ;;  %2559 = vmatpush1.bf16.msra.mxu1 %v2558_v22  ;;  %v993_v22 = vld [vmem:[%s3587_s6 + $0x38] sm:$0xff] }
 0x119   : > { %v846_v40 = vadd.f32 %v845_v38, %v705_v56  ;;  %v870_v41 = vadd.f32 %v869_v39, %v725_v29  ;;  %v3226_v56 = vld [vmem:[%s665_s27] sm:$0xff]  ;;  %v1294_v27 = vpop.permute.xlu1 %1293  ;;  %s644_s27 = sand.u32 1, %s2835_s30  }
 0x11a   : > { %v878_v44 = vmax.f32 %v844_v36, 0.0  ;;  %v886_v45 = vmax.f32 %v868_v37, 0.0  ;;  %s2476_s22 = sshll.u32 %s644_s27, 5  ;;  %s3529_s1 = scalar_lea.sflag [#allocation3], %s644_s27 }
 0x11b   : > { %v879_v48 = vmax.f32 %v846_v40, 0.0  ;;  %v887_v49 = vmax.f32 %v870_v41, 0.0  ;;  %v1299_v40 = vpop.permute.xlu0 %1298  ;;  %s646_s26 = scalar_lea.vmem [#allocation2], %s2476_s22  ;;  %s2771_s22 = scalar_lea.vmem %s2770_s20, 1024 }
 0x11c   : > { %v2562_v50 = vpack.c.bf16 %v878_v44, %v876_v42  ;;  %v2570_v51 = vpack.c.bf16 %v886_v45, %v884_v43  ;;  %s2371_s21 = sshll.u32 %s646_s26, 4  ;;  %s3527_s21 = int_to_ptr.vmem [resolvable:$true] %s2371_s21 }
 0x11d   : > { %v2560_v52 = vpack.c.bf16 %v879_v48, %v877_v46  ;;  %v2568_v53 = vpack.c.bf16 %v887_v49, %v885_v47  ;;  %v1304_v43 = vpop.permute.xlu1 %1303  ;;  %s2765_s23 = scalar_lea.vmem %s3527_s21, 512  ;;  %p2772_p4 = scmp.lt.s32.totalorder %s3527_s21, %s2770_s20 }
 0x11e   : > { %p2766_p0 = scmp.ne.s32.totalorder %s3527_s21, %s2765_s23  ;;  %p2773_p5 = scmp.lt.s32.totalorder %s2771_s22, %s2765_s23 }
 0x11f   : > { %2561 = vmatprep.subr.bf16.mxu1 %v2560_v52 }
 0x120   : > { %2563 = vmatpush1.bf16.msra.mxu1 %v2562_v50  ;;  %p2767_p1 = pnand %p2766_p0, %p3018_p3  ;;  %p2774_p6 = por %p2773_p5, %p2772_p4 }
 0x121   : > { %2565 = vmatprep.subr.bf16.mxu1 %v2564_v28 }
 0x122   : > { %p2768_p2 = pneg %p2767_p1 }
 0x124   : > { %2567 = vmatpush1.bf16.msra.mxu1 %v2566_v23  ;;  %p2775_p7 = pnand %p2774_p6, %p2768_p2 }
 0x125   : > { %2569 = vmatprep.subr.bf16.mxu1 %v2568_v53 }
 0x128   : > { %2571 = vmatpush1.bf16.msra.mxu1 %v2570_v51 }
 0x129   : > { %1027 = vmatprep.subr.mxu1 %v3220_v54 }
 0x12b   : > { %2493 = vmatmul.mubr.msk.f32.vlgmr.msra.gmra.mrb[8].mxu1 %vm902_vm2, %v888_v55 }
 0x12c   : > { %979 = vmatprep.mubr.f32.mxu1 %v2861_v0  ;;  %1028 = vmatpush1.msra.mxu1 %v3226_v56 }
 0x12f   : > { %2494 = vmatmul.mubr.msk.f32.gmra.mrb[10].mxu1 %vm902_vm2, %v889_v57 }
 0x130   : > { %1091 = vmatprep.mubr.f32.mxu1 %v2861_v0 }
 0x133   : > { %2495 = vmatmul.mubr.msk.f32.vlgmr.msra.gmra.mrb[12].mxu1 %vm1002_vm3, %v994_v58  ;;  %v1309_v58 = vpop.permute.xlu0 %1308 }
 0x134   : > { %1097 = vmatprep.mubr.f32.mxu1 %v2861_v0 }
 0x137   : > { %2496 = vmatmul.mubr.msk.f32.gmra.mrb[14].mxu1 %vm1002_vm3, %v995_v59 }
 0x138   : > { %1103 = vmatprep.mubr.f32.mxu1 %v2861_v0 }
 0x13b   : > { %2497 = vmatmul.mubr.msk.f32.gmra.mrb[16].mxu1 %vm1002_vm3, %v996_v60 }
 0x13c   : > { %1109 = vmatprep.mubr.f32.mxu1 %v2861_v0 }
 0x13f   : > { %2498 = vmatmul.mubr.msk.f32.gmra.mrb[18].mxu1 %vm1002_vm3, %v997_v61  ;;  %v1314_v61 = vpop.permute.xlu1 %1313 }
 0x140   : > { %1115 = vmatprep.mubr.f32.mxu1 %v2861_v0 }
 0x143   : > { %2499 = vmatmul.mubr.msk.f32.gmra.mrb[20].mxu1 %vm1002_vm3, %v998_v62 }
 0x144   : > { %1121 = vmatprep.mubr.f32.mxu1 %v2861_v0 }
 0x147   : > { %2500 = vmatmul.mubr.msk.f32.gmra.mrb[22].mxu1 %vm1002_vm3, %v999_v63 }
 0x148   : > { %1127 = vmatprep.mubr.f32.mxu1 %v2861_v0 }
 0x14b   : > { %2501 = vmatmul.mubr.msk.f32.gmra.mrb[24].mxu1 %vm1002_vm3, %v1000_v1 }
 0x14c   : > { %1133 = vmatprep.mubr.f32.mxu1 %v2861_v0 }
 0x14f   : > { %2502 = vmatmul.mubr.msk.f32.gmra.mrb[26].mxu1 %vm1002_vm3, %v1001_v2 }
 0x150   : > { %1229 = vmatprep.mubr.f32.mxu1 %v2861_v0 }
 0x1fe   : > { %v975_v3 = vpop.f32.mrb[8].mxu1 }
 0x1ff   : > { %v977_v4 = vpop.f32.mrb[9].mxu1  ;;  %v976_v8 = vadd.f32 %v975_v3, %v895_v5 }
 0x200   : > { %v978_v11 = vadd.f32 %v977_v4, %v895_v5 }
 0x202   : > { %v981_v7 = vpop.f32.mrb[10].mxu1 }
 0x203   : > { %v982_v9 = vadd.f32 %v981_v7, %v900_v6  ;;  %v983_v10 = vpop.f32.mrb[11].mxu1 }
 0x204   : > { %v984_v12 = vadd.f32 %v983_v10, %v900_v6 }
 0x205   : > { %v3276_v13 = vpack.c.bf16 %v982_v9, %v976_v8 }
 0x206   : > { %v3278_v14 = vpack.c.bf16 %v984_v12, %v978_v11  ;;  %v1319_v11 = vpop.permute.xlu0 %1318 }
 0x208   : > { %2573 = vmatprep.subr.bf16.mxu1 %v3278_v14 }
 0x209   : > { %2575 = vmatpush1.bf16.msra.mxu1 %v3276_v13 }
 0x20c   : > { %2503 = vmatmul.mubr.msk.f32.vlgmr.msra.gmra.mrb[12].mxu1 %vm1140_vm4, %v986_v15 }
 0x20d   : > { %1235 = vmatprep.mubr.f32.mxu1 %v2861_v0 }
 0x210   : > { %2504 = vmatmul.mubr.msk.f32.gmra.mrb[14].mxu1 %vm1140_vm4, %v987_v16  ;;  %v1324_v16 = vpop.permute.xlu1 %1323 }
 0x211   : > { %1241 = vmatprep.mubr.f32.mxu1 %v2861_v0 }
 0x214   : > { %2505 = vmatmul.mubr.msk.f32.gmra.mrb[16].mxu1 %vm1140_vm4, %v988_v17 }
 0x215   : > { %1247 = vmatprep.mubr.f32.mxu1 %v2861_v0 }
 0x218   : > { %2506 = vmatmul.mubr.msk.f32.gmra.mrb[18].mxu1 %vm1140_vm4, %v989_v18 }
 0x219   : > { %1253 = vmatprep.mubr.f32.mxu1 %v2861_v0 }
 0x21c   : > { %2507 = vmatmul.mubr.msk.f32.gmra.mrb[20].mxu1 %vm1140_vm4, %v990_v19 }
 0x21d   : > { %1259 = vmatprep.mubr.f32.mxu1 %v2861_v0 }
 0x220   : > { %2508 = vmatmul.mubr.msk.f32.gmra.mrb[22].mxu1 %vm1140_vm4, %v991_v20 }
 0x221   : > { %1265 = vmatprep.mubr.f32.mxu1 %v2861_v0 }
 0x224   : > { %2509 = vmatmul.mubr.msk.f32.gmra.mrb[24].mxu1 %vm1140_vm4, %v992_v21 }
 0x225   : > { %1271 = vmatprep.mubr.f32.mxu1 %v2861_v0 }
 0x228   : > { %2510 = vmatmul.mubr.msk.f32.gmra.mrb[26].mxu1 %vm1140_vm4, %v993_v22 }
 0x229   : > { %1502 = vmatprep.mubr.f32.mxu1 %v2861_v0 }
 0x2df   : > { %v1231_v23 = vpop.f32.mrb[12].mxu1 }
 0x2e0   : > { %v1233_v24 = vpop.f32.mrb[13].mxu1  ;;  %v1326_v26 = vadd.f32 %v1289_v25, %v1231_v23 }
 0x2e1   : > { %v1327_v28 = vadd.f32 %v1289_v25, %v1233_v24 }
 0x2e2   : > { %v1342_v33 = vmax.f32 %v1326_v26, 0.0 }
 0x2e3   : > { %v1237_v29 = vpop.f32.mrb[14].mxu1  ;;  %v1343_v35 = vmax.f32 %v1327_v28, 0.0  ;;  %v1358_v28 = vld [vmem:[%s3590_s9] sm:$0xff] }
 0x2e4   : > { %v1328_v30 = vadd.f32 %v1294_v27, %v1237_v29  ;;  %v1239_v31 = vpop.f32.mrb[15].mxu1  ;;  %v1359_v29 = vld [vmem:[%s3590_s9 + $0x8] sm:$0xff] }
 0x2e5   : > { %v1329_v32 = vadd.f32 %v1294_v27, %v1239_v31  ;;  %v1361_v31 = vld [vmem:[%s3590_s9 + $0x18] sm:$0xff] }
 0x2e6   : > { %v1344_v34 = vmax.f32 %v1328_v30, 0.0  ;;  %v1360_v30 = vld [vmem:[%s3590_s9 + $0x10] sm:$0xff] }
 0x2e7   : > { %v1345_v36 = vmax.f32 %v1329_v32, 0.0  ;;  %v1243_v37 = vpop.f32.mrb[16].mxu1  ;;  %v1362_v32 = vld [vmem:[%s3590_s9 + $0x20] sm:$0xff] }
 0x2e8   : > { %v2578_v38 = vpack.c.bf16 %v1344_v34, %v1342_v33  ;;  %v1245_v39 = vpop.f32.mrb[17].mxu1  ;;  %v1330_v42 = vadd.f32 %v1299_v40, %v1243_v37  ;;  %v1363_v33 = vld [vmem:[%s3590_s9 + $0x28] sm:$0xff]  ;;  %v1364_v34 = vld [vmem:[%s3590_s9 + $0x30] sm:$0xff] }
 0x2e9   : > { %v2576_v41 = vpack.c.bf16 %v1345_v36, %v1343_v35  ;;  %v1331_v44 = vadd.f32 %v1299_v40, %v1245_v39  ;;  %v1365_v35 = vld [vmem:[%s3590_s9 + $0x38] sm:$0xff]  ;;  %v1382_v40 = vpop.permute.xlu1 %1381 }
 0x2ea   : > { %v1346_v49 = vmax.f32 %v1330_v42, 0.0 }
 0x2eb   : > { %v1249_v45 = vpop.f32.mrb[18].mxu1  ;;  %2577 = vmatprep.subr.bf16.mxu1 %v2576_v41  ;;  %v1347_v51 = vmax.f32 %v1331_v44, 0.0 }
 0x2ec   : > { %v1332_v46 = vadd.f32 %v1304_v43, %v1249_v45  ;;  %v1251_v47 = vpop.f32.mrb[19].mxu1  ;;  %2579 = vmatpush1.bf16.msra.mxu1 %v2578_v38  ;;  %v1377_v38 = vpop.permute.xlu0 %1376 }
 0x2ed   : > { %v1333_v48 = vadd.f32 %v1304_v43, %v1251_v47 }
 0x2ee   : > { %v1348_v50 = vmax.f32 %v1332_v46, 0.0 }
 0x2ef   : > { %v1349_v52 = vmax.f32 %v1333_v48, 0.0  ;;  %v1255_v53 = vpop.f32.mrb[20].mxu1 }
 0x2f0   : > { %v2582_v55 = vpack.c.bf16 %v1348_v50, %v1346_v49  ;;  %v1257_v57 = vpop.f32.mrb[21].mxu1  ;;  %v1334_v60 = vadd.f32 %v1309_v58, %v1255_v53  ;;  %v1387_v53 = vpop.permute.xlu0 %1386 }
 0x2f1   : > { %v2580_v59 = vpack.c.bf16 %v1349_v52, %v1347_v51  ;;  %v1335_v62 = vadd.f32 %v1309_v58, %v1257_v57  ;;  %v1392_v58 = vpop.permute.xlu1 %1391 }
 0x2f2   : > { %v1350_v4 = vmax.f32 %v1334_v60, 0.0 }
 0x2f3   : > { %v1261_v63 = vpop.f32.mrb[22].mxu1  ;;  %2581 = vmatprep.subr.bf16.mxu1 %v2580_v59  ;;  %v1351_v6 = vmax.f32 %v1335_v62, 0.0 }
 0x2f4   : > { %v1336_v1 = vadd.f32 %v1314_v61, %v1261_v63  ;;  %v1263_v2 = vpop.f32.mrb[23].mxu1  ;;  %2583 = vmatpush1.bf16.msra.mxu1 %v2582_v55 }
 0x2f5   : > { %v1337_v3 = vadd.f32 %v1314_v61, %v1263_v2 }
 0x2f6   : > { %v1352_v5 = vmax.f32 %v1336_v1, 0.0 }
 0x2f7   : > { %v1353_v7 = vmax.f32 %v1337_v3, 0.0  ;;  %v1267_v8 = vpop.f32.mrb[24].mxu1 }
 0x2f8   : > { %v2586_v9 = vpack.c.bf16 %v1352_v5, %v1350_v4  ;;  %v1269_v10 = vpop.f32.mrb[25].mxu1  ;;  %v1338_v15 = vadd.f32 %v1319_v11, %v1267_v8  ;;  %v1397_v8 = vpop.permute.xlu0 %1396 }
 0x2f9   : > { %v2584_v12 = vpack.c.bf16 %v1353_v7, %v1351_v6  ;;  %v1339_v17 = vadd.f32 %v1319_v11, %v1269_v10  ;;  %v1402_v11 = vpop.permute.xlu1 %1401 }
 0x2fa   : > { %v1354_v22 = vmax.f32 %v1338_v15, 0.0 }
 0x2fb   : > { %v1273_v18 = vpop.f32.mrb[26].mxu1  ;;  %2585 = vmatprep.subr.bf16.mxu1 %v2584_v12  ;;  %v1355_v24 = vmax.f32 %v1339_v17, 0.0 }
 0x2fc   : > { %v1340_v19 = vadd.f32 %v1324_v16, %v1273_v18  ;;  %v1275_v20 = vpop.f32.mrb[27].mxu1  ;;  %2587 = vmatpush1.bf16.msra.mxu1 %v2586_v9 }
 0x2fd   : > { %v1341_v21 = vadd.f32 %v1324_v16, %v1275_v20 }
 0x2fe   : > { %v1356_v23 = vmax.f32 %v1340_v19, 0.0 }
 0x2ff   : > { %v1357_v25 = vmax.f32 %v1341_v21, 0.0 }
 0x300   : > { %v2590_v26 = vpack.c.bf16 %v1356_v23, %v1354_v22 }
 0x301   : > { %v2588_v27 = vpack.c.bf16 %v1357_v25, %v1355_v24 }
 0x303   : > { %2589 = vmatprep.subr.bf16.mxu1 %v2588_v27 }
 0x304   : > { %2591 = vmatpush1.bf16.msra.mxu1 %v2590_v26  ;;  %v1407_v26 = vpop.permute.xlu0 %1406 }
 0x307   : > { %2511 = vmatmul.mubr.msk.f32.vlgmr.msra.gmra.mrb[28].mxu1 %vm902_vm2, %v1358_v28 }
 0x308   : > { %1508 = vmatprep.mubr.f32.mxu1 %v2861_v0 }
 0x30b   : > { %2512 = vmatmul.mubr.msk.f32.gmra.mrb[30].mxu1 %vm902_vm2, %v1359_v29  ;;  %v1412_v29 = vpop.permute.xlu1 %1411 }
 0x30c   : > { %1514 = vmatprep.mubr.f32.mxu1 %v2861_v0 }
 0x30f   : > { %2513 = vmatmul.mubr.msk.f32.gmra.mrb[32].mxu1 %vm902_vm2, %v1360_v30 }
 0x310   : > { %1520 = vmatprep.mubr.f32.mxu1 %v2861_v0 }
 0x313   : > { %2514 = vmatmul.mubr.msk.f32.gmra.mrb[34].mxu1 %vm902_vm2, %v1361_v31 }
 0x314   : > { %1526 = vmatprep.mubr.f32.mxu1 %v2861_v0 }
 0x317   : > { %2515 = vmatmul.mubr.msk.f32.gmra.mrb[36].mxu1 %vm902_vm2, %v1362_v32 }
 0x318   : > { %1532 = vmatprep.mubr.f32.mxu1 %v2861_v0 }
 0x31b   : > { %2516 = vmatmul.mubr.msk.f32.gmra.mrb[38].mxu1 %vm902_vm2, %v1363_v33 }
 0x31c   : > { %1538 = vmatprep.mubr.f32.mxu1 %v2861_v0 }
 0x31f   : > { %2517 = vmatmul.mubr.msk.f32.gmra.mrb[40].mxu1 %vm902_vm2, %v1364_v34 }
 0x320   : > { %1544 = vmatprep.mubr.f32.mxu1 %v2861_v0 }
 0x323   : > { %2518 = vmatmul.mubr.msk.f32.gmra.mrb[42].mxu1 %vm902_vm2, %v1365_v35 }
 0x324   : > { %2338 = vmatprep.mubr.f32.mxu1 %v2861_v0 }
 0x3da   : > { %v1504_v36 = vpop.f32.mrb[28].mxu1 }
 0x3db   : > { %v1506_v37 = vpop.f32.mrb[29].mxu1  ;;  %v1505_v39 = vadd.f32 %v1504_v36, %v1377_v38 }
 0x3dc   : > { %v1507_v41 = vadd.f32 %v1506_v37, %v1377_v38 }
 0x3dd   : > { %v1551_v46 = vmax.f32 %v1505_v39, 0.0 }
 0x3de   : > { %v1510_v42 = vpop.f32.mrb[30].mxu1  ;;  %v1552_v48 = vmax.f32 %v1507_v41, 0.0  ;;  %v1567_v41 = vld [vmem:[%s3592_s11] sm:$0xff] }
 0x3df   : > { %v1511_v43 = vadd.f32 %v1510_v42, %v1382_v40  ;;  %v1512_v44 = vpop.f32.mrb[31].mxu1  ;;  %v1568_v42 = vld [vmem:[%s3592_s11 + $0x8] sm:$0xff] }
 0x3e0   : > { %v1513_v45 = vadd.f32 %v1512_v44, %v1382_v40  ;;  %v1730_v44 = vld [vmem:[%s3595_s14] sm:$0xff] }
 0x3e1   : > { %v1553_v47 = vmax.f32 %v1511_v43, 0.0  ;;  %v1569_v43 = vld [vmem:[%s3592_s11 + $0x10] sm:$0xff] }
 0x3e2   : > { %v1554_v49 = vmax.f32 %v1513_v45, 0.0  ;;  %v1516_v50 = vpop.f32.mrb[32].mxu1  ;;  %v1731_v45 = vld [vmem:[%s3595_s14 + $0x8] sm:$0xff] }
 0x3e3   : > { %v2594_v51 = vpack.c.bf16 %v1553_v47, %v1551_v46  ;;  %v1518_v52 = vpop.f32.mrb[33].mxu1  ;;  %v1517_v57 = vadd.f32 %v1516_v50, %v1387_v53  ;;  %v1732_v46 = vld [vmem:[%s3595_s14 + $0x10] sm:$0xff]  ;;  %v1733_v47 = vld [vmem:[%s3595_s14 + $0x18] sm:$0xff] }
 0x3e4   : > { %v2592_v55 = vpack.c.bf16 %v1554_v49, %v1552_v48  ;;  %v1519_v59 = vadd.f32 %v1518_v52, %v1387_v53  ;;  %v1734_v48 = vld [vmem:[%s3595_s14 + $0x20] sm:$0xff]  ;;  %v1735_v49 = vld [vmem:[%s3595_s14 + $0x28] sm:$0xff]  ;;  %v1736_v50 = vld [vmem:[%s3595_s14 + $0x30] sm:$0xff] }
 0x3e5   : > { %v1555_v1 = vmax.f32 %v1517_v57, 0.0 }
 0x3e6   : > { %v1522_v60 = vpop.f32.mrb[34].mxu1  ;;  %2593 = vmatprep.subr.bf16.mxu0 %v2592_v55  ;;  %v1556_v3 = vmax.f32 %v1519_v59, 0.0  ;;  %v1580_v55 = vpop.permute.xlu0 %1579 }
 0x3e7   : > { %v1523_v61 = vadd.f32 %v1522_v60, %v1392_v58  ;;  %v1524_v62 = vpop.f32.mrb[35].mxu1  ;;  %2595 = vmatpush1.bf16.msra.mxu0 %v2594_v51  ;;  %v1737_v51 = vld [vmem:[%s3595_s14 + $0x38] sm:$0xff] }
 0x3e8   : > { %v1525_v63 = vadd.f32 %v1524_v62, %v1392_v58  ;;  %v1585_v58 = vpop.permute.xlu1 %1584 }
 0x3e9   : > { %v1557_v2 = vmax.f32 %v1523_v61, 0.0 }
 0x3ea   : > { %v1558_v4 = vmax.f32 %v1525_v63, 0.0  ;;  %v1528_v5 = vpop.f32.mrb[36].mxu1 }
 0x3eb   : > { %v2598_v6 = vpack.c.bf16 %v1557_v2, %v1555_v1  ;;  %v1530_v7 = vpop.f32.mrb[37].mxu1  ;;  %v1529_v10 = vadd.f32 %v1528_v5, %v1397_v8 }
 0x3ec   : > { %v2596_v9 = vpack.c.bf16 %v1558_v4, %v1556_v3  ;;  %v1531_v12 = vadd.f32 %v1530_v7, %v1397_v8  ;;  %v1590_v8 = vpop.permute.xlu0 %1589 }
 0x3ed   : > { %v1559_v19 = vmax.f32 %v1529_v10, 0.0 }
 0x3ee   : > { %v1534_v15 = vpop.f32.mrb[38].mxu1  ;;  %2597 = vmatprep.subr.bf16.mxu0 %v2596_v9  ;;  %v1560_v21 = vmax.f32 %v1531_v12, 0.0 }
 0x3ef   : > { %v1535_v16 = vadd.f32 %v1534_v15, %v1402_v11  ;;  %v1536_v17 = vpop.f32.mrb[39].mxu1  ;;  %2599 = vmatpush1.bf16.msra.mxu0 %v2598_v6 }
 0x3f0   : > { %v1537_v18 = vadd.f32 %v1536_v17, %v1402_v11  ;;  %v1595_v11 = vpop.permute.xlu1 %1594 }
 0x3f1   : > { %v1561_v20 = vmax.f32 %v1535_v16, 0.0 }
 0x3f2   : > { %v1562_v22 = vmax.f32 %v1537_v18, 0.0  ;;  %v1540_v23 = vpop.f32.mrb[40].mxu1 }
 0x3f3   : > { %v2602_v24 = vpack.c.bf16 %v1561_v20, %v1559_v19  ;;  %v1542_v25 = vpop.f32.mrb[41].mxu1  ;;  %v1541_v28 = vadd.f32 %v1540_v23, %v1407_v26 }
 0x3f4   : > { %v2600_v27 = vpack.c.bf16 %v1562_v22, %v1560_v21  ;;  %v1543_v30 = vadd.f32 %v1542_v25, %v1407_v26 }
 0x3f5   : > { %v1563_v35 = vmax.f32 %v1541_v28, 0.0 }
 0x3f6   : > { %v1546_v31 = vpop.f32.mrb[42].mxu1  ;;  %2601 = vmatprep.subr.bf16.mxu0 %v2600_v27  ;;  %v1564_v37 = vmax.f32 %v1543_v30, 0.0 }
 0x3f7   : > { %v1547_v32 = vadd.f32 %v1546_v31, %v1412_v29  ;;  %v1548_v33 = vpop.f32.mrb[43].mxu1  ;;  %2603 = vmatpush1.bf16.msra.mxu0 %v2602_v24  ;;  %v1600_v24 = vpop.permute.xlu0 %1599 }
 0x3f8   : > { %v1549_v34 = vadd.f32 %v1548_v33, %v1412_v29  ;;  %v1723_v33 = vld [vmem:[%s3594_s13 + $0x8] sm:$0xff] }
 0x3f9   : > { %v1565_v36 = vmax.f32 %v1547_v32, 0.0  ;;  %v1722_v32 = vld [vmem:[%s3594_s13] sm:$0xff] }
 0x3fa   : > { %v1566_v38 = vmax.f32 %v1549_v34, 0.0  ;;  %v1724_v34 = vld [vmem:[%s3594_s13 + $0x10] sm:$0xff] }
 0x3fb   : > { %v2606_v39 = vpack.c.bf16 %v1565_v36, %v1563_v35  ;;  %v1727_v35 = vld [vmem:[%s3594_s13 + $0x28] sm:$0xff]  ;;  %v1728_v36 = vld [vmem:[%s3594_s13 + $0x30] sm:$0xff] }
 0x3fc   : > { %v2604_v40 = vpack.c.bf16 %v1566_v38, %v1564_v37  ;;  %v1729_v37 = vld [vmem:[%s3594_s13 + $0x38] sm:$0xff]  ;;  %v2013_v38 = vld [vmem:[%s3596_s15] sm:$0xff] }
 0x3fe   : > { %2605 = vmatprep.subr.bf16.mxu0 %v2604_v40  ;;  %v2015_v40 = vld [vmem:[%s3596_s15 + $0x10] sm:$0xff] }
 0x3ff   : > { %2607 = vmatpush1.bf16.msra.mxu0 %v2606_v39  ;;  %v2014_v39 = vld [vmem:[%s3596_s15 + $0x8] sm:$0xff] }
 0x400   : > { %2609 = vmatprep.subr.bf16.mxu0 %v3278_v14  ;;  %v1571_v14 = vld [vmem:[%s3592_s11 + $0x20] sm:$0xff] }
 0x402   : > { %2519 = vmatmul.mubr.msk.f32.vlgmr.msra.gmra.mrb[8].mxu0 %vm902_vm2, %v1567_v41  ;;  %v2016_v41 = vld [vmem:[%s3596_s15 + $0x18] sm:$0xff] }
 0x403   : > { %2611 = vmatpush1.bf16.msra.mxu0 %v3276_v13  ;;  %1687 = vmatprep.mubr.f32.mxu0 %v2861_v0  ;;  %v1570_v13 = vld [vmem:[%s3592_s11 + $0x18] sm:$0xff] }
 0x406   : > { %2520 = vmatmul.mubr.msk.f32.gmra.mrb[10].mxu0 %vm902_vm2, %v1568_v42  ;;  %v2017_v42 = vld [vmem:[%s3596_s15 + $0x20] sm:$0xff] }
 0x407   : > { %1693 = vmatprep.mubr.f32.mxu0 %v2861_v0 }
 0x40a   : > { %2521 = vmatmul.mubr.msk.f32.gmra.mrb[12].mxu0 %vm902_vm2, %v1569_v43  ;;  %v2018_v43 = vld [vmem:[%s3596_s15 + $0x28] sm:$0xff] }
 0x40b   : > { %1699 = vmatprep.mubr.f32.mxu0 %v2861_v0 }
 0x40e   : > { %2522 = vmatmul.mubr.msk.f32.gmra.mrb[14].mxu0 %vm902_vm2, %v1570_v13  ;;  %v2019_v13 = vld [vmem:[%s3596_s15 + $0x30] sm:$0xff] }
 0x40f   : > { %1705 = vmatprep.mubr.f32.mxu0 %v2861_v0 }
 0x412   : > { %2523 = vmatmul.mubr.msk.f32.gmra.mrb[16].mxu0 %vm902_vm2, %v1571_v14  ;;  %v2020_v14 = vld [vmem:[%s3596_s15 + $0x38] sm:$0xff] }
 0x413   : > { %1826 = vmatprep.mubr.f32.mxu0 %v2861_v0 }
 0x416   : > { %2524 = vmatmul.mubr.msk.f32.vlgmr.msra.gmra.mrb[18].mxu0 %vm1140_vm4, %v1730_v44 }
 0x417   : > { %1832 = vmatprep.mubr.f32.mxu0 %v2861_v0 }
 0x41a   : > { %2525 = vmatmul.mubr.msk.f32.gmra.mrb[20].mxu0 %vm1140_vm4, %v1731_v45 }
 0x41b   : > { %1838 = vmatprep.mubr.f32.mxu0 %v2861_v0 }
 0x41e   : > { %2526 = vmatmul.mubr.msk.f32.gmra.mrb[22].mxu0 %vm1140_vm4, %v1732_v46  ;;  %v2185_v46 = vpop.permute.xlu1 %2184 }
 0x41f   : > { %1844 = vmatprep.mubr.f32.mxu0 %v2861_v0 }
 0x422   : > { %2527 = vmatmul.mubr.msk.f32.gmra.mrb[24].mxu0 %vm1140_vm4, %v1733_v47 }
 0x423   : > { %1850 = vmatprep.mubr.f32.mxu0 %v2861_v0 }
 0x426   : > { %2528 = vmatmul.mubr.msk.f32.gmra.mrb[26].mxu0 %vm1140_vm4, %v1734_v48  ;;  %v2190_v48 = vpop.permute.xlu0 %2189 }
 0x427   : > { %1856 = vmatprep.mubr.f32.mxu0 %v2861_v0 }
 0x42a   : > { %2529 = vmatmul.mubr.msk.f32.gmra.mrb[28].mxu0 %vm1140_vm4, %v1735_v49 }
 0x42b   : > { %1862 = vmatprep.mubr.f32.mxu0 %v2861_v0 }
 0x42e   : > { %2530 = vmatmul.mubr.msk.f32.gmra.mrb[30].mxu0 %vm1140_vm4, %v1736_v50 }
 0x42f   : > { %1868 = vmatprep.mubr.f32.mxu0 %v2861_v0 }
 0x432   : > { %2531 = vmatmul.mubr.msk.f32.gmra.mrb[32].mxu0 %vm1140_vm4, %v1737_v51 }
 0x433   : > { %1964 = vmatprep.mubr.f32.mxu0 %v2861_v0 }
 0x4d5   : > { %v1683_v52 = vpop.f32.mrb[8].mxu0 }
 0x4d6   : > { %v1685_v53 = vpop.f32.mrb[9].mxu0  ;;  %v1684_v57 = vadd.f32 %v1683_v52, %v1580_v55 }
 0x4d7   : > { %v1686_v59 = vadd.f32 %v1685_v53, %v1580_v55 }
 0x4d8   : > { %v1712_v1 = vmax.f32 %v1684_v57, 0.0 }
 0x4d9   : > { %v1689_v60 = vpop.f32.mrb[10].mxu0  ;;  %v1713_v3 = vmax.f32 %v1686_v59, 0.0 }
 0x4da   : > { %v1690_v61 = vadd.f32 %v1689_v60, %v1585_v58  ;;  %v1691_v62 = vpop.f32.mrb[11].mxu0 }
 0x4db   : > { %v1692_v63 = vadd.f32 %v1691_v62, %v1585_v58 }
 0x4dc   : > { %v1714_v2 = vmax.f32 %v1690_v61, 0.0 }
 0x4dd   : > { %v1715_v4 = vmax.f32 %v1692_v63, 0.0  ;;  %v1695_v5 = vpop.f32.mrb[12].mxu0  ;;  %v2195_v63 = vpop.permute.xlu1 %2194 }
 0x4de   : > { %v2614_v6 = vpack.c.bf16 %v1714_v2, %v1712_v1  ;;  %v1697_v7 = vpop.f32.mrb[13].mxu0  ;;  %v1696_v10 = vadd.f32 %v1695_v5, %v1590_v8 }
 0x4df   : > { %v2612_v9 = vpack.c.bf16 %v1715_v4, %v1713_v3  ;;  %v1698_v12 = vadd.f32 %v1697_v7, %v1590_v8  ;;  %v2200_v3 = vpop.permute.xlu0 %2199 }
 0x4e0   : > { %v1716_v19 = vmax.f32 %v1696_v10, 0.0 }
 0x4e1   : > { %v1701_v15 = vpop.f32.mrb[14].mxu0  ;;  %2613 = vmatprep.subr.bf16.mxu0 %v2612_v9  ;;  %v1717_v21 = vmax.f32 %v1698_v12, 0.0 }
 0x4e2   : > { %v1702_v16 = vadd.f32 %v1701_v15, %v1595_v11  ;;  %v1703_v17 = vpop.f32.mrb[15].mxu0  ;;  %2615 = vmatpush1.bf16.msra.mxu0 %v2614_v6 }
 0x4e3   : > { %v1704_v18 = vadd.f32 %v1703_v17, %v1595_v11 }
 0x4e4   : > { %v1718_v20 = vmax.f32 %v1702_v16, 0.0 }
 0x4e5   : > { %v1719_v22 = vmax.f32 %v1704_v18, 0.0  ;;  %v1707_v23 = vpop.f32.mrb[16].mxu0  ;;  %v2205_v18 = vpop.permute.xlu1 %2204 }
 0x4e6   : > { %v2618_v25 = vpack.c.bf16 %v1718_v20, %v1716_v19  ;;  %v1709_v26 = vpop.f32.mrb[17].mxu0  ;;  %v1708_v29 = vadd.f32 %v1707_v23, %v1600_v24 }
 0x4e7   : > { %v2616_v27 = vpack.c.bf16 %v1719_v22, %v1717_v21  ;;  %v1710_v28 = vadd.f32 %v1709_v26, %v1600_v24  ;;  %v2210_v21 = vpop.permute.xlu0 %2209 }
 0x4e8   : > { %v1720_v31 = vmax.f32 %v1708_v29, 0.0 }
 0x4e9   : > { %v1721_v30 = vmax.f32 %v1710_v28, 0.0  ;;  %2617 = vmatprep.subr.bf16.mxu0 %v2616_v27 }
 0x4ea   : > { %2619 = vmatpush1.bf16.msra.mxu0 %v2618_v25 }
 0x4eb   : > { %1908 = vmatprep.subr.mxu0 %v1721_v30 }
 0x4ee   : > { %1909 = vmatpush1.msra.mxu0 %v1720_v31 }
 0x4ef   : > { %2532 = vmatmul.mubr.msk.f32.vlgmr.msra.gmra.mrb[18].mxu0 %vm1875_vm5, %v1722_v32  ;;  %2045 = vmatprep.subr.mxu0 %v3220_v54  ;;  %v1725_v54 = vld [vmem:[%s3594_s13 + $0x18] sm:$0xff] }
 0x4f0   : > { %1970 = vmatprep.mubr.f32.mxu0 %v2861_v0  ;;  %2046 = vmatpush1.msra.mxu0 %v3226_v56  ;;  %v1726_v56 = vld [vmem:[%s3594_s13 + $0x20] sm:$0xff] }
 0x4f3   : > { %2533 = vmatmul.mubr.msk.f32.gmra.mrb[20].mxu0 %vm1875_vm5, %v1723_v33 }
 0x4f4   : > { %1976 = vmatprep.mubr.f32.mxu0 %v2861_v0 }
 0x4f7   : > { %2534 = vmatmul.mubr.msk.f32.gmra.mrb[22].mxu0 %vm1875_vm5, %v1724_v34  ;;  %v2215_v34 = vpop.permute.xlu1 %2214 }
 0x4f8   : > { %1982 = vmatprep.mubr.f32.mxu0 %v2861_v0 }
 0x4fb   : > { %2535 = vmatmul.mubr.msk.f32.gmra.mrb[24].mxu0 %vm1875_vm5, %v1725_v54 }
 0x4fc   : > { %1988 = vmatprep.mubr.f32.mxu0 %v2861_v0 }
 0x4ff   : > { %2536 = vmatmul.mubr.msk.f32.gmra.mrb[26].mxu0 %vm1875_vm5, %v1726_v56 }
 0x500   : > { %1994 = vmatprep.mubr.f32.mxu0 %v2861_v0 }
 0x503   : > { %2537 = vmatmul.mubr.msk.f32.gmra.mrb[28].mxu0 %vm1875_vm5, %v1727_v35  ;;  %v2220_v35 = vpop.permute.xlu0 %2219 }
 0x504   : > { %2000 = vmatprep.mubr.f32.mxu0 %v2861_v0 }
 0x507   : > { %2538 = vmatmul.mubr.msk.f32.gmra.mrb[30].mxu0 %vm1875_vm5, %v1728_v36 }
 0x508   : > { %2006 = vmatprep.mubr.f32.mxu0 %v2861_v0 }
 0x50b   : > { %2539 = vmatmul.mubr.msk.f32.gmra.mrb[32].mxu0 %vm1875_vm5, %v1729_v37 }
 0x50c   : > { %2109 = vmatprep.mubr.f32.mxu0 %v2861_v0 }
 0x50f   : > { %2540 = vmatmul.mubr.msk.f32.vlgmr.msra.gmra.mrb[18].mxu0 %vm1002_vm3, %v2013_v38 }
 0x510   : > { %2115 = vmatprep.mubr.f32.mxu0 %v2861_v0 }
 0x513   : > { %2541 = vmatmul.mubr.msk.f32.gmra.mrb[20].mxu0 %vm1002_vm3, %v2014_v39 }
 0x514   : > { %2121 = vmatprep.mubr.f32.mxu0 %v2861_v0 }
 0x517   : > { %2542 = vmatmul.mubr.msk.f32.gmra.mrb[22].mxu0 %vm1002_vm3, %v2015_v40 }
 0x518   : > { %2127 = vmatprep.mubr.f32.mxu0 %v2861_v0 }
 0x51b   : > { %2543 = vmatmul.mubr.msk.f32.gmra.mrb[24].mxu0 %vm1002_vm3, %v2016_v41 }
 0x51c   : > { %2133 = vmatprep.mubr.f32.mxu0 %v2861_v0 }
 0x51f   : > { %2544 = vmatmul.mubr.msk.f32.gmra.mrb[26].mxu0 %vm1002_vm3, %v2017_v42 }
 0x520   : > { %2139 = vmatprep.mubr.f32.mxu0 %v2861_v0 }
 0x523   : > { %2545 = vmatmul.mubr.msk.f32.gmra.mrb[28].mxu0 %vm1002_vm3, %v2018_v43 }
 0x524   : > { %2145 = vmatprep.mubr.f32.mxu0 %v2861_v0 }
 0x527   : > { %2546 = vmatmul.mubr.msk.f32.gmra.mrb[30].mxu0 %vm1002_vm3, %v2019_v13 }
 0x528   : > { %2151 = vmatprep.mubr.f32.mxu0 %v2861_v0 }
 0x52b   : > { %2547 = vmatmul.mubr.msk.f32.gmra.mrb[32].mxu0 %vm1002_vm3, %v2020_v14 }
 0x5e2   : > { %v2111_v44 = vpop.f32.mrb[18].mxu0 }
 0x5e3   : > { %v2113_v45 = vpop.f32.mrb[19].mxu0  ;;  %v2222_v47 = vadd.f32 %v2185_v46, %v2111_v44 }
 0x5e4   : > { %v2223_v49 = vadd.f32 %v2185_v46, %v2113_v45  ;;  %v2254_v45 = vld [vmem:[%s3643_s25] sm:$0xff]  ;;  %v2255_v46 = vld [vmem:[%s3643_s25 + $0x8] sm:$0xff] }
 0x5e5   : > { %v2238_v55 = vmax.f32 %v2222_v47, 0.0  ;;  %v2261_v47 = vpop.permute.xlu1 %2260 }
 0x5e6   : > { %v2117_v50 = vpop.f32.mrb[20].mxu0  ;;  %v2239_v58 = vmax.f32 %v2223_v49, 0.0 }
 0x5e7   : > { %v2224_v51 = vadd.f32 %v2190_v48, %v2117_v50  ;;  %v2119_v52 = vpop.f32.mrb[21].mxu0 }
 0x5e8   : > { %v2225_v53 = vadd.f32 %v2190_v48, %v2119_v52 }
 0x5e9   : > { %v2240_v57 = vmax.f32 %v2224_v51, 0.0 }
 0x5ea   : > { %v2241_v59 = vmax.f32 %v2225_v53, 0.0  ;;  %v2123_v60 = vpop.f32.mrb[22].mxu0 }
 0x5eb   : > { %v2622_v61 = vpack.c.bf16 %v2240_v57, %v2238_v55  ;;  %v2125_v62 = vpop.f32.mrb[23].mxu0  ;;  %v2226_v2 = vadd.f32 %v2195_v63, %v2123_v60 }
 0x5ec   : > { %v2620_v1 = vpack.c.bf16 %v2241_v59, %v2239_v58  ;;  %v2227_v4 = vadd.f32 %v2195_v63, %v2125_v62 }
 0x5ed   : > { %v2242_v9 = vmax.f32 %v2226_v2, 0.0 }
 0x5ee   : > { %v2129_v5 = vpop.f32.mrb[24].mxu0  ;;  %2621 = vmatprep.subr.bf16.mxu1 %v2620_v1  ;;  %v2243_v11 = vmax.f32 %v2227_v4, 0.0 }
 0x5ef   : > { %v2228_v6 = vadd.f32 %v2200_v3, %v2129_v5  ;;  %v2131_v7 = vpop.f32.mrb[25].mxu0  ;;  %2623 = vmatpush1.bf16.msra.mxu1 %v2622_v61 }
 0x5f0   : > { %v2229_v8 = vadd.f32 %v2200_v3, %v2131_v7 }
 0x5f1   : > { %v2244_v10 = vmax.f32 %v2228_v6, 0.0 }
 0x5f2   : > { %v2245_v12 = vmax.f32 %v2229_v8, 0.0  ;;  %v2135_v15 = vpop.f32.mrb[26].mxu0 }
 0x5f3   : > { %v2626_v16 = vpack.c.bf16 %v2244_v10, %v2242_v9  ;;  %v2137_v17 = vpop.f32.mrb[27].mxu0  ;;  %v2230_v20 = vadd.f32 %v2205_v18, %v2135_v15 }
 0x5f4   : > { %v2624_v19 = vpack.c.bf16 %v2245_v12, %v2243_v11  ;;  %v2231_v22 = vadd.f32 %v2205_v18, %v2137_v17 }
 0x5f5   : > { %v2246_v27 = vmax.f32 %v2230_v20, 0.0 }
 0x5f6   : > { %v2141_v23 = vpop.f32.mrb[28].mxu0  ;;  %2625 = vmatprep.subr.bf16.mxu1 %v2624_v19  ;;  %v2247_v29 = vmax.f32 %v2231_v22, 0.0 }
 0x5f7   : > { %v2232_v24 = vadd.f32 %v2210_v21, %v2141_v23  ;;  %v2143_v25 = vpop.f32.mrb[29].mxu0  ;;  %2627 = vmatpush1.bf16.msra.mxu1 %v2626_v16 }
 0x5f8   : > { %v2233_v26 = vadd.f32 %v2210_v21, %v2143_v25 }
 0x5f9   : > { %v2248_v28 = vmax.f32 %v2232_v24, 0.0 }
 0x5fa   : > { %v2249_v30 = vmax.f32 %v2233_v26, 0.0  ;;  %v2147_v31 = vpop.f32.mrb[30].mxu0 }
 0x5fb   : > { %v2630_v32 = vpack.c.bf16 %v2248_v28, %v2246_v27  ;;  %v2149_v33 = vpop.f32.mrb[31].mxu0  ;;  %v2234_v56 = vadd.f32 %v2215_v34, %v2147_v31 }
 0x5fc   : > { %v2628_v54 = vpack.c.bf16 %v2249_v30, %v2247_v29  ;;  %v2235_v36 = vadd.f32 %v2215_v34, %v2149_v33 }
 0x5fd   : > { %v2250_v41 = vmax.f32 %v2234_v56, 0.0 }
 0x5fe   : > { %v2153_v37 = vpop.f32.mrb[32].mxu0  ;;  %2629 = vmatprep.subr.bf16.mxu1 %v2628_v54  ;;  %v2251_v43 = vmax.f32 %v2235_v36, 0.0 }
 0x5ff   : > { %v2236_v38 = vadd.f32 %v2220_v35, %v2153_v37  ;;  %v2155_v39 = vpop.f32.mrb[33].mxu0  ;;  %2631 = vmatpush1.bf16.msra.mxu1 %v2630_v32 }
 0x600   : > { %v2237_v40 = vadd.f32 %v2220_v35, %v2155_v39 }
 0x601   : > { %v2252_v42 = vmax.f32 %v2236_v38, 0.0 }
 0x602   : > { %v2253_v13 = vmax.f32 %v2237_v40, 0.0 }
 0x603   : > { %v2634_v14 = vpack.c.bf16 %v2252_v42, %v2250_v41 }
 0x604   : > { %v2632_v44 = vpack.c.bf16 %v2253_v13, %v2251_v43 }
 0x606   : > { %2633 = vmatprep.subr.bf16.mxu1 %v2632_v44 }
 0x607   : > { %2635 = vmatpush1.bf16.msra.mxu1 %v2634_v14 }
 0x60a   : > { %2548 = vmatmul.mubr.msk.f32.vlgmr.msra.gmra.mrb[44].mxu1 %vm902_vm2, %v2254_v45 }
 0x60b   : > { %2344 = vmatprep.mubr.f32.mxu1 %v2861_v0  ;;  %v2266_v0 = vpop.permute.xlu0 %2265 }
 0x60e   : > { %2549 = vmatmul.mubr.msk.f32.gmra.mrb[46].mxu1 %vm902_vm2, %v2255_v46 }
 0x6dd   : > { %v2340_v48 = vpop.f32.mrb[44].mxu1 }
 0x6de   : > { %v2341_v49 = vadd.f32 %v2340_v48, %v2261_v47  ;;  %v2342_v50 = vpop.f32.mrb[45].mxu1 }
 0x6df   : > { %v2343_v51 = vadd.f32 %v2342_v50, %v2261_v47 }
 0x6e0   : > { %2351 = vst [vmem:[%s646_s26] sm:$0xff] %v2341_v49 }
 0x6e1   : > { %2352 = vst [vmem:[%s646_s26 + $0x8] sm:$0xff] %v2343_v51  ;;  %v2346_v52 = vpop.f32.mrb[46].mxu1 }
 0x6e2   : > { %v2347_v53 = vadd.f32 %v2346_v52, %v2266_v0  ;;  %v2348_v55 = vpop.f32.mrb[47].mxu1 }
 0x6e3   : > { %v2349_v57 = vadd.f32 %v2348_v55, %v2266_v0 }
 0x6e4   : > { %2353 = vst [vmem:[%s646_s26 + $0x10] sm:$0xff] %v2347_v53 }
 0x6e5   : > { %2354 = vst [vmem:[%s646_s26 + $0x18] sm:$0xff] %v2349_v57 }
 0x6e6   : > { %2778 = shalt.err (!%p2775_p7)
}
 0x6e7   : > { %s2779_s27 = scalar_lea.hbm %s3525_s19, 512  ;;  %s2783_s26 = scalar_lea.hbm %s3645_s17, 2048 }
 0x6e8   : > { %p2780_p9 = scmp.ne.s32.totalorder %s3525_s19, %s2779_s27  ;;  %p2784_p12 = scmp.lt.u32.totalorder %s3525_s19, %s3645_s17 }
 0x6e9   : > { %p2785_p13 = scmp.lt.u32.totalorder %s2783_s26, %s2779_s27  ;;  %p2787_p1 = scmp.lt.u32.totalorder %s2779_s27, %s3525_s19 }
 0x6ea   : > { %p2781_p10 = pnand %p2780_p9, %p3018_p3 }
 0x6eb   : > { %p2786_p0 = por %p2785_p13, %p2784_p12 }
 0x6ec   : > { %p2782_p11 = pneg %p2781_p10 }
 0x6ed   : > { %p2788_p2 = por %p2787_p1, %p2786_p0 }
 0x6ef   : > { %p2789_p4 = pnand %p2788_p2, %p2782_p11 }
 0x6f1   : > { %2792 = shalt.err (!%p2789_p4)
}
 0x6f2   : > { %s2864_s23 = smov 256   ;;  %s2865_s20 = smov 512  }
 0x6f3   : > { %s2866_s22 = smov 16  }
 0x6f4   : > { %2686 = dma.vmem_to_hbm [thread:$0]  (%p3018_p3), %s3527_s21, 512, %s3525_s19, %s3529_s1, %s2864_s23, %s2865_s20, %s2866_s22  }
 0x6f5 PF: > { %s3646_s29 = sld [smem:[#allocation9_spill]]  ;;  %s3647_s2 = sld [smem:[#allocation5_spill]] }
 0x6fb   : > { %p2692_p5 = scmp.ge.s32.totalorder %s3646_s29, 2  ;;  %s2386_s26 = sand.u32 1, %s3647_s2  }
 0x6fc   : > { %s2387_s27 = scalar_lea.sflag [#allocation3], %s2386_s26 }
 0x6fd   : > { %p2689_p6 = pnand %p2692_p5, %p3027_p8 }
 0x6ff   : > { %2826 = dma.done.wait (!%p2689_p6), %s2387_s27, 512  }
 0x700   : > { %2828 = vsyncadd (!%p2689_p6), %s2387_s27, 4294966784  ;;  %s32_s23 = sadd.s32 1, %s3646_s29   ;;  %s3649_s3 = sld [smem:[#allocation6_spill]] }
 0x701   : > { %p29_p7 = scmp.ge.s32.totalorder %s32_s23, 6   ;;  %s3650_s20 = sld [smem:[#allocation14_spill]] }
 0x702   : > { %s3651_s21 = sld [smem:[#allocation7_spill]]  ;;  %s3652_s1 = sld [smem:[#allocation8_spill]] }
 0x703   : > { %s3653_s22 = sld [smem:[#allocation10_spill]]  ;;  %s3654_s2 = sld [smem:[#allocation12_spill]] }
 0x704   : > { %s3655_s0 = smov %s2835_s30  ;;  %31 = sbr.rel (!%p29_p7) target bundleno = 12 (0xc), region = 134 }
 0x706   : > { %s3656_s30 = smov %s3649_s3 }
 0x70b   :  { %2392 = vsyncpa [#allocation3], 1 }
 0x70c   :  { %2394 = vsyncpa [#allocation3 + $0x1], 1 }

</bundles_post_ra>
